<compile_context>
chip_gen: v7x
topology: tpu7x:2x2x1
jax: 0.10.0
libtpu: 0.0.40
codegen_flags: <defaults>
</compile_context>

<pallas_src>
import functools

import jax
import jax.numpy as jnp
from jax import lax
from jax.experimental import pallas as pl
from jax.experimental.pallas import tpu as pltpu

D_MODEL = 9
N_HEADS = 3
HEAD_SIZE = D_MODEL // N_HEADS          # 3
R_MLP = 4
D_MLP = D_MODEL * R_MLP                 # 36
LN_EPS = 1e-5                           # torch.nn.LayerNorm default

# ---- packed parameter slab layout (one (128,128) f32 input) -----------------
SLAB_SHAPE = (128, 128)
_R_WQKV = 0     # rows [0,9)    cols [0,27)   fused QKV weight (D, 3D)
_R_WO = 16      # rows [16,25)  cols [0,9)    output projection (D, D)
_R_W1 = 32      # rows [32,41)  cols [0,36)   MLP in (D, D_MLP)
_R_W2 = 48      # rows [48,84)  cols [0,9)    MLP out (D_MLP, D)
_R_VEC = 88     # rows [88,96)  cols [0,36)   packed small vectors (8, D_MLP)
_R_POOL = 96    # rows [96,105) cols [0,3)    channel->head sum matrix (D, H)
_R_POOLT = 112  # rows [112,115) cols [0,9)   head->channel broadcast (H, D)

# Row indices inside the packed small-vector block (8, D_MLP).
_V_LN1_W, _V_LN1_B, _V_LN2_W, _V_LN2_B, _V_BO, _V_B2, _V_B1, _V_BQKV = range(8)


# --------------------------------------------------------------------------- #
# Kernel
# --------------------------------------------------------------------------- #
def _layernorm(x, w, b):
    mu = jnp.mean(x, axis=-1, keepdims=True)
    var = jnp.mean((x - mu) ** 2, axis=-1, keepdims=True)   # biased, like torch
    return (x - mu) * lax.rsqrt(var + LN_EPS) * w + b


def _gelu_exact(x):
    # torch.nn.GELU default (approximate='none'): 0.5*x*(1+erf(x/sqrt(2)))
    return 0.5 * x * (1.0 + lax.erf(x * 0.7071067811865475))


def encoder_kernel(x_ref, slab_ref, o_ref, *, seq_len):
    S = seq_len
    BT = x_ref.shape[0]
    D = D_MODEL
    N = BT * S

    # ---- static views into the single packed parameter slab -----------------
    wqkv = slab_ref[_R_WQKV:_R_WQKV + D, 0:3 * D]            # (9, 27)
    wo = slab_ref[_R_WO:_R_WO + D, 0:D]                      # (9, 9)
    w1 = slab_ref[_R_W1:_R_W1 + D, 0:D_MLP]                  # (9, 36)
    w2 = slab_ref[_R_W2:_R_W2 + D_MLP, 0:D]                  # (36, 9)
    vecs = slab_ref[_R_VEC:_R_VEC + 8, 0:D_MLP]              # (8, 36)
    pool = slab_ref[_R_POOL:_R_POOL + D, 0:N_HEADS]          # (9, 3) channel->head
    pool_t = slab_ref[_R_POOLT:_R_POOLT + N_HEADS, 0:D]      # (3, 9) head->channel

    ln1_w = vecs[_V_LN1_W:_V_LN1_W + 1, :D]
    ln1_b = vecs[_V_LN1_B:_V_LN1_B + 1, :D]
    ln2_w = vecs[_V_LN2_W:_V_LN2_W + 1, :D]
    ln2_b = vecs[_V_LN2_B:_V_LN2_B + 1, :D]
    bo = vecs[_V_BO:_V_BO + 1, :D]
    b2 = vecs[_V_B2:_V_B2 + 1, :D]
    b1 = vecs[_V_B1:_V_B1 + 1, :D_MLP]
    bqkv = vecs[_V_BQKV:_V_BQKV + 1, :3 * D]

    # (BT, S, D) or lane-dense (BT, S*D) block -> flattened (rows, D) math view.
    x = x_ref[...].reshape(N, D)

    # --- out1 = x + MHA(LN1(x)) ----------------------------------------------
    x_ln = _layernorm(x, ln1_w, ln1_b)
    qkv = jnp.dot(x_ln, wqkv, preferred_element_type=jnp.float32) + bqkv  # (N, 27)

    q3 = qkv[:, 0:D].reshape(BT, S, D)            # (BT, S, 9), head-major channels
    k3 = qkv[:, D:2 * D].reshape(BT, S, D)
    v3 = qkv[:, 2 * D:3 * D].reshape(BT, S, D)

    scale = 1.0 / (HEAD_SIZE ** 0.5)

    # All-head attention scores without tiny per-head MXU dispatches:
    # per-channel q*k products on the VPU, then one big-M (rows, 9)x(9, 3)
    # "head pooling" matmul sums each head's 3 channels.
    prod = q3[:, :, None, :] * k3[:, None, :, :]                    # (BT, Sq, Sk, 9)
    scores = jnp.dot(prod.reshape(N * S, D), pool,
                     preferred_element_type=jnp.float32) * scale    # (BT*Sq*Sk, 3)
    scores = scores.reshape(BT, S, S, N_HEADS)                      # (BT, Sq, Sk, H)

    # Softmax over the key axis (sublane reduction), per head.
    scores = scores - jnp.max(scores, axis=2, keepdims=True)
    pattn = jnp.exp(scores)
    inv = pl.reciprocal(jnp.sum(pattn, axis=2, keepdims=True), approx=True)
    pattn = pattn * inv                                             # (BT, Sq, Sk, H)

    # p @ V for all heads: broadcast head weights back to channels with one
    # (rows, 3)x(3, 9) matmul, multiply by V and contract Sk on the VPU.
    p_ch = jnp.dot(pattn.reshape(N * S, N_HEADS), pool_t,
                   preferred_element_type=jnp.float32).reshape(BT, S, S, D)
    ctx = jnp.sum(p_ch * v3[:, None, :, :], axis=2)                 # (BT, Sq, 9)

    att = jnp.dot(ctx.reshape(N, D), wo, preferred_element_type=jnp.float32)
    out1 = x + att + bo

    # --- out = out1 + MLP(LN2(out1)) -----------------------------------------
    ln2 = _layernorm(out1, ln2_w, ln2_b)
    h1 = jnp.dot(ln2, w1, preferred_element_type=jnp.float32) + b1
    h1 = _gelu_exact(h1)
    h2 = jnp.dot(h1, w2, preferred_element_type=jnp.float32) + b2

    o_ref[...] = (out1 + h2).reshape(o_ref.shape)


# --------------------------------------------------------------------------- #
# Parameter packing
# --------------------------------------------------------------------------- #
def _pad_row(v, width):
    v = jnp.asarray(v, jnp.float32).reshape(-1)
    return jnp.pad(v, (0, width - v.shape[0]))


def pack_params(p):
    """Repack torch-style params into one (128,128) f32 slab."""
    # Fused QKV weight: columns [Q_h0|Q_h1|Q_h2 | K_... | V_...], each head
    # occupying HEAD_SIZE consecutive columns (matches torch.cat of heads).
    wq = jnp.transpose(p["wq"], (1, 0, 2)).reshape(D_MODEL, D_MODEL)
    wk = jnp.transpose(p["wk"], (1, 0, 2)).reshape(D_MODEL, D_MODEL)
    wv = jnp.transpose(p["wv"], (1, 0, 2)).reshape(D_MODEL, D_MODEL)
    wqkv = jnp.concatenate([wq, wk, wv], axis=1)                     # (D, 3D)
    bqkv = jnp.concatenate([p["bq"].reshape(-1),
                            p["bk"].reshape(-1),
                            p["bv"].reshape(-1)])                    # (3D,)

    rows = [None] * 8
    rows[_V_LN1_W] = p["ln1_w"]
    rows[_V_LN1_B] = p["ln1_b"]
    rows[_V_LN2_W] = p["ln2_w"]
    rows[_V_LN2_B] = p["ln2_b"]
    rows[_V_BO] = p["bo"]
    rows[_V_B2] = p["b2"]
    rows[_V_B1] = p["b1"]
    rows[_V_BQKV] = bqkv
    vecs = jnp.stack([_pad_row(r, D_MLP) for r in rows])             # (8, 36)

    head_of_channel = jnp.arange(D_MODEL) // HEAD_SIZE
    pool = (head_of_channel[:, None] ==
            jnp.arange(N_HEADS)[None, :]).astype(jnp.float32)        # (9, 3)

    slab = jnp.zeros(SLAB_SHAPE, jnp.float32)
    slab = slab.at[_R_WQKV:_R_WQKV + D_MODEL, 0:3 * D_MODEL].set(wqkv)
    slab = slab.at[_R_WO:_R_WO + D_MODEL, 0:D_MODEL].set(p["wo"])
    slab = slab.at[_R_W1:_R_W1 + D_MODEL, 0:D_MLP].set(p["w1"])
    slab = slab.at[_R_W2:_R_W2 + D_MLP, 0:D_MODEL].set(p["w2"])
    slab = slab.at[_R_VEC:_R_VEC + 8, 0:D_MLP].set(vecs)
    slab = slab.at[_R_POOL:_R_POOL + D_MODEL, 0:N_HEADS].set(pool)
    slab = slab.at[_R_POOLT:_R_POOLT + N_HEADS, 0:D_MODEL].set(pool.T)
    return slab


# --------------------------------------------------------------------------- #
# Tiling policy (VMEM-budgeted, generation-aware)
# --------------------------------------------------------------------------- #
def _round_up(n, m):
    return (n + m - 1) // m * m


def _vmem_capacity_bytes():
    try:
        return int(pltpu.get_tpu_info().vmem_capacity_bytes)
    except Exception:
        return 64 << 20        # conservative: v7x per-core VMEM


def _num_tensorcores():
    try:
        return max(1, int(getattr(jax.devices()[0], "num_cores", 1) or 1))
    except Exception:
        return 1


def _is_lane_dense(bt, S):
    # Lane-dense (B, S*D) blocks only pay off once a tile carries >= ~1k token
    # rows (perf review); also respect the (8,128) block-shape rule.
    return bt * S >= 1024 and (bt % 8 == 0)


def _tile_vmem_bytes(bt, S, D, lane_dense):
    """Estimated f32 VMEM bytes a (bt,...) grid step needs."""
    if lane_dense:
        tile = _round_up(bt, 8) * _round_up(S * D, 128) * 4
    else:
        tile = bt * _round_up(S, 8) * _round_up(D, 128) * 4
    io = 4 * tile                       # x + out, each double-buffered by Pallas
    # Straight-line intermediates kept live per token row (qkv, MLP hidden,
    # a few D-wide temps, and the (Sq,Sk,·) score/prob slabs), lane-padded.
    per_row = (_round_up(3 * D, 128) + _round_up(D_MLP, 128)
               + 4 * _round_up(D, 128)) * 4
    per_row += 2 * S * _round_up(D, 128) * 4          # prod / p_ch slabs
    per_row += 2 * S * _round_up(N_HEADS, 128) * 4    # scores / pattn slabs
    return io + bt * S * per_row


def _select_batch_tile(B, S, D, n_cores, budget):
    divisors = [d for d in range(1, B + 1) if B % d == 0]
    # Feed every TensorCore: prefer tiles that give >= n_cores grid steps.
    cands = [d for d in divisors if B // d >= n_cores] or divisors
    for bt in sorted(cands, reverse=True):
        if _tile_vmem_bytes(bt, S, D, _is_lane_dense(bt, S)) <= budget:
            return bt
    return min(cands)


# --------------------------------------------------------------------------- #
# Wrapper
# --------------------------------------------------------------------------- #
def transformer_encoder(x, params, *, batch_tile=None):
    B, S, D = x.shape
    assert D == D_MODEL
    slab = pack_params(params)

    cap = _vmem_capacity_bytes()
    n_cores = _num_tensorcores()
    # ~1/4 of physical VMEM, capped at 16 MiB (fits v5e's small scoped default
    # comfortably and v7x's 64 MiB physical VMEM with margin).
    budget = min(cap // 4, 16 << 20)

    if batch_tile is None:
        batch_tile = _select_batch_tile(B, S, D, n_cores, budget)
    assert B % batch_tile == 0
    grid = (B // batch_tile,)

    lane_dense = _is_lane_dense(batch_tile, S)
    if lane_dense:
        # Free contiguous reshape in XLA; kernel stores a 72-lane-dense block.
        x_in = x.reshape(B, S * D)
        io_spec = pl.BlockSpec((batch_tile, S * D), lambda b: (b, 0))
        out_shape = jax.ShapeDtypeStruct((B, S * D), jnp.float32)
    else:
        x_in = x
        io_spec = pl.BlockSpec((batch_tile, S, D), lambda b: (b, 0, 0))
        out_shape = jax.ShapeDtypeStruct((B, S, D), jnp.float32)

    slab_spec = pl.BlockSpec(slab.shape, lambda b: (0, 0))

    # Raise the scoped-VMEM limit only when the estimated need exceeds the
    # smallest (v5e) default.
    need = (_tile_vmem_bytes(batch_tile, S, D, lane_dense)
            + 2 * slab.size * 4 + (2 << 20))
    cp_kwargs = dict(dimension_semantics=("parallel",))
    if need > (16 << 20):
        cp_kwargs["vmem_limit_bytes"] = int(min(cap, max(need, 32 << 20)))

    kernel = functools.partial(encoder_kernel, seq_len=S)
    out = pl.pallas_call(
        kernel,
        out_shape=out_shape,
        grid_spec=pltpu.PrefetchScalarGridSpec(
            num_scalar_prefetch=0,
            grid=grid,
            in_specs=[io_spec, slab_spec],
            out_specs=io_spec,
        ),
        compiler_params=pltpu.CompilerParams(**cp_kwargs),
    )(x_in, slab)
    return out.reshape(B, S, D)


# --------------------------------------------------------------------------- #
# Test harness
# --------------------------------------------------------------------------- #
def init_params(key):
    ks = jax.random.split(key, 12)
    p = {
        # LayerNorm: torch default init (weight=1, bias=0)
        "ln1_w": jnp.ones((1, D_MODEL), jnp.float32),
        "ln1_b": jnp.zeros((1, D_MODEL), jnp.float32),
        "ln2_w": jnp.ones((1, D_MODEL), jnp.float32),
        "ln2_b": jnp.zeros((1, D_MODEL), jnp.float32),
        # per-head Q/K/V projections, stored (H, in=D, out=head_size)
        "wq": 0.2 * jax.random.normal(ks[0], (N_HEADS, D_MODEL, HEAD_SIZE), jnp.float32),
        "wk": 0.2 * jax.random.normal(ks[1], (N_HEADS, D_MODEL, HEAD_SIZE), jnp.float32),
        "wv": 0.2 * jax.random.normal(ks[2], (N_HEADS, D_MODEL, HEAD_SIZE), jnp.float32),
        "bq": 0.05 * jax.random.normal(ks[3], (N_HEADS, HEAD_SIZE), jnp.float32),
        "bk": 0.05 * jax.random.normal(ks[4], (N_HEADS, HEAD_SIZE), jnp.float32) + 0.01,
        "bv": 0.05 * jax.random.normal(ks[5], (N_HEADS, HEAD_SIZE), jnp.float32) - 0.01,
        # output projection (in=D, out=D)
        "wo": 0.2 * jax.random.normal(ks[6], (D_MODEL, D_MODEL), jnp.float32),
        "bo": 0.05 * jax.random.normal(ks[7], (1, D_MODEL), jnp.float32),
        # MLP
        "w1": 0.2 * jax.random.normal(ks[8], (D_MODEL, D_MLP), jnp.float32),
        "b1": 0.05 * jax.random.normal(ks[9], (1, D_MLP), jnp.float32),
        "w2": 0.2 * jax.random.normal(ks[10], (D_MLP, D_MODEL), jnp.float32),
        "b2": 0.05 * jax.random.normal(ks[11], (1, D_MODEL), jnp.float32),
    }
    return p


def reference(x, p):
    """Pure-JAX reference mirroring the PyTorch forward, for validation."""
    def ln(z, w, b):
        mu = z.mean(-1, keepdims=True)
        var = ((z - mu) ** 2).mean(-1, keepdims=True)
        return (z - mu) / jnp.sqrt(var + LN_EPS) * w + b

    xl = ln(x, p["ln1_w"][0], p["ln1_b"][0])
    heads = []
    for h in range(N_HEADS):
        q = xl @ p["wq"][h] + p["bq"][h]
        k = xl @ p["wk"][h] + p["bk"][h]
        v = xl @ p["wv"][h] + p["bv"][h]
        a = jnp.einsum("bqd,bkd->bqk", q, k) / (HEAD_SIZE ** 0.5)
        a = jax.nn.softmax(a, axis=-1)
        heads.append(a @ v)
    att = jnp.concatenate(heads, -1) @ p["wo"] + p["bo"][0]
    o1 = x + att
    l2 = ln(o1, p["ln2_w"][0], p["ln2_b"][0])
    h1 = jax.nn.gelu(l2 @ p["w1"] + p["b1"][0], approximate=False)
    return o1 + h1 @ p["w2"] + p["b2"][0]


if __name__ == "__main__":
    key = jax.random.PRNGKey(0)
    k_x, k_p = jax.random.split(key)

    B, S = 2, 8
    x = jax.random.normal(k_x, (B, S, D_MODEL), jnp.float32)
    params = init_params(k_p)

    out = transformer_encoder(x, params)
    out = jax.block_until_ready(out)

    ref = reference(x, params)
    assert out.shape == (B, S, D_MODEL)
    # Tolerance covers the EUP approximate reciprocal in the softmax
    # (pl.reciprocal(approx=True), ~2^-12 relative error).
    assert jnp.allclose(out, ref, atol=1e-3, rtol=1e-3), (
        f"max abs err {jnp.max(jnp.abs(out - ref))}")

    print("KERNEL_OK")
</pallas_src>

<mosaic_0001>
module attributes {stable_mosaic.version = 11 : i64} {
  func.func @encoder_kernel(%arg0: i32, %arg1: memref<2x8x9xf32, #tpu.memory_space<vmem>>, %arg2: memref<128x128xf32, #tpu.memory_space<vmem>>, %arg3: memref<2x8x9xf32, #tpu.memory_space<vmem>>) attributes {dimension_semantics = [#tpu.dimension_semantics<parallel>], iteration_bounds = array<i64: 1>, scalar_prefetch = 0 : i64, scratch_operands = 0 : i64, tpu.core_type = #tpu.core_type<tc>, window_params = [{transform_indices = @transform_0, window_bounds = array<i64: 2, 8, 9>}, {pipeline_mode = #tpu.pipeline_mode<synchronous>, transform_indices = @transform_1, window_bounds = array<i64: 128, 128>}, {transform_indices = @transform_2, window_bounds = array<i64: 2, 8, 9>}]} {
    %c0 = arith.constant 0 : index
    %c0_0 = arith.constant 0 : index
    %0 = vector.load %arg2[%c0, %c0_0] : memref<128x128xf32, #tpu.memory_space<vmem>>, vector<9x27xf32>
    %c16 = arith.constant 16 : index
    %c0_1 = arith.constant 0 : index
    %1 = vector.load %arg2[%c16, %c0_1] : memref<128x128xf32, #tpu.memory_space<vmem>>, vector<9x9xf32>
    %c32 = arith.constant 32 : index
    %c0_2 = arith.constant 0 : index
    %2 = vector.load %arg2[%c32, %c0_2] : memref<128x128xf32, #tpu.memory_space<vmem>>, vector<9x36xf32>
    %c48 = arith.constant 48 : index
    %c0_3 = arith.constant 0 : index
    %3 = vector.load %arg2[%c48, %c0_3] : memref<128x128xf32, #tpu.memory_space<vmem>>, vector<36x9xf32>
    %c88 = arith.constant 88 : index
    %c0_4 = arith.constant 0 : index
    %4 = vector.load %arg2[%c88, %c0_4] : memref<128x128xf32, #tpu.memory_space<vmem>>, vector<8x36xf32>
    %c96 = arith.constant 96 : index
    %c0_5 = arith.constant 0 : index
    %5 = vector.load %arg2[%c96, %c0_5] : memref<128x128xf32, #tpu.memory_space<vmem>>, vector<9x3xf32>
    %c112 = arith.constant 112 : index
    %c0_6 = arith.constant 0 : index
    %6 = vector.load %arg2[%c112, %c0_6] : memref<128x128xf32, #tpu.memory_space<vmem>>, vector<3x9xf32>
    %7 = vector.extract_strided_slice %4 {offsets = [0, 0], sizes = [1, 9], strides = [1, 1]} : vector<8x36xf32> to vector<1x9xf32>
    %8 = vector.extract_strided_slice %4 {offsets = [1, 0], sizes = [1, 9], strides = [1, 1]} : vector<8x36xf32> to vector<1x9xf32>
    %9 = vector.extract_strided_slice %4 {offsets = [2, 0], sizes = [1, 9], strides = [1, 1]} : vector<8x36xf32> to vector<1x9xf32>
    %10 = vector.extract_strided_slice %4 {offsets = [3, 0], sizes = [1, 9], strides = [1, 1]} : vector<8x36xf32> to vector<1x9xf32>
    %11 = vector.extract_strided_slice %4 {offsets = [4, 0], sizes = [1, 9], strides = [1, 1]} : vector<8x36xf32> to vector<1x9xf32>
    %12 = vector.extract_strided_slice %4 {offsets = [5, 0], sizes = [1, 9], strides = [1, 1]} : vector<8x36xf32> to vector<1x9xf32>
    %13 = vector.extract_strided_slice %4 {offsets = [6, 0], sizes = [1, 36], strides = [1, 1]} : vector<8x36xf32> to vector<1x36xf32>
    %14 = vector.extract_strided_slice %4 {offsets = [7, 0], sizes = [1, 27], strides = [1, 1]} : vector<8x36xf32> to vector<1x27xf32>
    %c0_7 = arith.constant 0 : index
    %c0_8 = arith.constant 0 : index
    %c0_9 = arith.constant 0 : index
    %15 = vector.load %arg1[%c0_7, %c0_8, %c0_9] : memref<2x8x9xf32, #tpu.memory_space<vmem>>, vector<2x8x9xf32>
    %16 = vector.shape_cast %15 : vector<2x8x9xf32> to vector<16x9xf32>
    %cst = arith.constant dense<0.000000e+00> : vector<16xf32>
    %17 = vector.multi_reduction <add>, %16, %cst [1] : vector<16x9xf32> to vector<16xf32>
    %18 = vector.shape_cast %17 : vector<16xf32> to vector<16x1xf32>
    %cst_10 = arith.constant 9.000000e+00 : f32
    %19 = vector.broadcast %cst_10 : f32 to vector<16x1xf32>
    %20 = arith.divf %18, %19 : vector<16x1xf32>
    %21 = vector.broadcast %20 : vector<16x1xf32> to vector<16x9xf32>
    %22 = arith.subf %16, %21 : vector<16x9xf32>
    %23 = arith.mulf %22, %22 : vector<16x9xf32>
    %cst_11 = arith.constant dense<0.000000e+00> : vector<16xf32>
    %24 = vector.multi_reduction <add>, %23, %cst_11 [1] : vector<16x9xf32> to vector<16xf32>
    %25 = vector.shape_cast %24 : vector<16xf32> to vector<16x1xf32>
    %cst_12 = arith.constant 9.000000e+00 : f32
    %26 = vector.broadcast %cst_12 : f32 to vector<16x1xf32>
    %27 = arith.divf %25, %26 : vector<16x1xf32>
    %28 = vector.broadcast %20 : vector<16x1xf32> to vector<16x9xf32>
    %29 = arith.subf %16, %28 : vector<16x9xf32>
    %cst_13 = arith.constant 9.99999974E-6 : f32
    %30 = vector.broadcast %cst_13 : f32 to vector<16x1xf32>
    %31 = arith.addf %27, %30 : vector<16x1xf32>
    %32 = math.rsqrt %31 : vector<16x1xf32>
    %33 = vector.broadcast %32 : vector<16x1xf32> to vector<16x9xf32>
    %34 = arith.mulf %29, %33 : vector<16x9xf32>
    %35 = vector.broadcast %7 : vector<1x9xf32> to vector<16x9xf32>
    %36 = arith.mulf %34, %35 : vector<16x9xf32>
    %37 = vector.broadcast %8 : vector<1x9xf32> to vector<16x9xf32>
    %38 = arith.addf %36, %37 : vector<16x9xf32>
    %cst_14 = arith.constant dense<0.000000e+00> : vector<16x27xf32>
    %39 = tpu.matmul %38, %0, %cst_14 {dimension_numbers = #tpu.dot_dimension_numbers<[1], [0], [0], [1], [0, 0, 1, 1], [], []>} : vector<16x9xf32>, vector<9x27xf32>, vector<16x27xf32> -> vector<16x27xf32>
    %40 = vector.broadcast %14 : vector<1x27xf32> to vector<16x27xf32>
    %41 = arith.addf %39, %40 : vector<16x27xf32>
    %42 = vector.extract_strided_slice %41 {offsets = [0, 0], sizes = [16, 9], strides = [1, 1]} : vector<16x27xf32> to vector<16x9xf32>
    %43 = vector.shape_cast %42 : vector<16x9xf32> to vector<2x8x9xf32>
    %44 = vector.extract_strided_slice %41 {offsets = [0, 9], sizes = [16, 9], strides = [1, 1]} : vector<16x27xf32> to vector<16x9xf32>
    %45 = vector.shape_cast %44 : vector<16x9xf32> to vector<2x8x9xf32>
    %46 = vector.extract_strided_slice %41 {offsets = [0, 18], sizes = [16, 9], strides = [1, 1]} : vector<16x27xf32> to vector<16x9xf32>
    %47 = vector.shape_cast %46 : vector<16x9xf32> to vector<2x8x9xf32>
    %48 = vector.shape_cast %43 : vector<2x8x9xf32> to vector<2x8x1x9xf32>
    %49 = vector.shape_cast %45 : vector<2x8x9xf32> to vector<2x1x8x9xf32>
    %50 = vector.broadcast %48 : vector<2x8x1x9xf32> to vector<2x8x8x9xf32>
    %51 = vector.broadcast %49 : vector<2x1x8x9xf32> to vector<2x8x8x9xf32>
    %52 = arith.mulf %50, %51 : vector<2x8x8x9xf32>
    %53 = vector.shape_cast %52 : vector<2x8x8x9xf32> to vector<128x9xf32>
    %cst_15 = arith.constant dense<0.000000e+00> : vector<128x3xf32>
    %54 = tpu.matmul %53, %5, %cst_15 {dimension_numbers = #tpu.dot_dimension_numbers<[1], [0], [0], [1], [0, 0, 1, 1], [], []>} : vector<128x9xf32>, vector<9x3xf32>, vector<128x3xf32> -> vector<128x3xf32>
    %cst_16 = arith.constant 0.577350259 : f32
    %55 = vector.broadcast %cst_16 : f32 to vector<128x3xf32>
    %56 = arith.mulf %54, %55 : vector<128x3xf32>
    %57 = vector.shape_cast %56 : vector<128x3xf32> to vector<2x8x8x3xf32>
    %cst_17 = arith.constant dense<0xFF800000> : vector<2x8x3xf32>
    %58 = vector.multi_reduction <maximumf>, %57, %cst_17 [2] : vector<2x8x8x3xf32> to vector<2x8x3xf32>
    %59 = vector.shape_cast %58 : vector<2x8x3xf32> to vector<2x8x1x3xf32>
    %60 = vector.broadcast %59 : vector<2x8x1x3xf32> to vector<2x8x8x3xf32>
    %61 = arith.subf %57, %60 : vector<2x8x8x3xf32>
    %62 = math.exp %61 : vector<2x8x8x3xf32>
    %cst_18 = arith.constant dense<0.000000e+00> : vector<2x8x3xf32>
    %63 = vector.multi_reduction <add>, %62, %cst_18 [2] : vector<2x8x8x3xf32> to vector<2x8x3xf32>
    %64 = vector.shape_cast %63 : vector<2x8x3xf32> to vector<2x8x1x3xf32>
    %65 = tpu.reciprocal %64 {approx = true} : vector<2x8x1x3xf32> -> vector<2x8x1x3xf32>
    %66 = vector.broadcast %65 : vector<2x8x1x3xf32> to vector<2x8x8x3xf32>
    %67 = arith.mulf %62, %66 : vector<2x8x8x3xf32>
    %68 = vector.shape_cast %67 : vector<2x8x8x3xf32> to vector<128x3xf32>
    %cst_19 = arith.constant dense<0.000000e+00> : vector<128x9xf32>
    %69 = tpu.matmul %68, %6, %cst_19 {dimension_numbers = #tpu.dot_dimension_numbers<[1], [0], [0], [1], [0, 0, 1, 1], [], []>} : vector<128x3xf32>, vector<3x9xf32>, vector<128x9xf32> -> vector<128x9xf32>
    %70 = vector.shape_cast %69 : vector<128x9xf32> to vector<2x8x8x9xf32>
    %71 = vector.shape_cast %47 : vector<2x8x9xf32> to vector<2x1x8x9xf32>
    %72 = vector.broadcast %71 : vector<2x1x8x9xf32> to vector<2x8x8x9xf32>
    %73 = arith.mulf %70, %72 : vector<2x8x8x9xf32>
    %cst_20 = arith.constant dense<0.000000e+00> : vector<2x8x9xf32>
    %74 = vector.multi_reduction <add>, %73, %cst_20 [2] : vector<2x8x8x9xf32> to vector<2x8x9xf32>
    %75 = vector.shape_cast %74 : vector<2x8x9xf32> to vector<16x9xf32>
    %cst_21 = arith.constant dense<0.000000e+00> : vector<16x9xf32>
    %76 = tpu.matmul %75, %1, %cst_21 {dimension_numbers = #tpu.dot_dimension_numbers<[1], [0], [0], [1], [0, 0, 1, 1], [], []>} : vector<16x9xf32>, vector<9x9xf32>, vector<16x9xf32> -> vector<16x9xf32>
    %77 = arith.addf %16, %76 : vector<16x9xf32>
    %78 = vector.broadcast %11 : vector<1x9xf32> to vector<16x9xf32>
    %79 = arith.addf %77, %78 : vector<16x9xf32>
    %cst_22 = arith.constant dense<0.000000e+00> : vector<16xf32>
    %80 = vector.multi_reduction <add>, %79, %cst_22 [1] : vector<16x9xf32> to vector<16xf32>
    %81 = vector.shape_cast %80 : vector<16xf32> to vector<16x1xf32>
    %cst_23 = arith.constant 9.000000e+00 : f32
    %82 = vector.broadcast %cst_23 : f32 to vector<16x1xf32>
    %83 = arith.divf %81, %82 : vector<16x1xf32>
    %84 = vector.broadcast %83 : vector<16x1xf32> to vector<16x9xf32>
    %85 = arith.subf %79, %84 : vector<16x9xf32>
    %86 = arith.mulf %85, %85 : vector<16x9xf32>
    %cst_24 = arith.constant dense<0.000000e+00> : vector<16xf32>
    %87 = vector.multi_reduction <add>, %86, %cst_24 [1] : vector<16x9xf32> to vector<16xf32>
    %88 = vector.shape_cast %87 : vector<16xf32> to vector<16x1xf32>
    %cst_25 = arith.constant 9.000000e+00 : f32
    %89 = vector.broadcast %cst_25 : f32 to vector<16x1xf32>
    %90 = arith.divf %88, %89 : vector<16x1xf32>
    %91 = vector.broadcast %83 : vector<16x1xf32> to vector<16x9xf32>
    %92 = arith.subf %79, %91 : vector<16x9xf32>
    %cst_26 = arith.constant 9.99999974E-6 : f32
    %93 = vector.broadcast %cst_26 : f32 to vector<16x1xf32>
    %94 = arith.addf %90, %93 : vector<16x1xf32>
    %95 = math.rsqrt %94 : vector<16x1xf32>
    %96 = vector.broadcast %95 : vector<16x1xf32> to vector<16x9xf32>
    %97 = arith.mulf %92, %96 : vector<16x9xf32>
    %98 = vector.broadcast %9 : vector<1x9xf32> to vector<16x9xf32>
    %99 = arith.mulf %97, %98 : vector<16x9xf32>
    %100 = vector.broadcast %10 : vector<1x9xf32> to vector<16x9xf32>
    %101 = arith.addf %99, %100 : vector<16x9xf32>
    %cst_27 = arith.constant dense<0.000000e+00> : vector<16x36xf32>
    %102 = tpu.matmul %101, %2, %cst_27 {dimension_numbers = #tpu.dot_dimension_numbers<[1], [0], [0], [1], [0, 0, 1, 1], [], []>} : vector<16x9xf32>, vector<9x36xf32>, vector<16x36xf32> -> vector<16x36xf32>
    %103 = vector.broadcast %13 : vector<1x36xf32> to vector<16x36xf32>
    %104 = arith.addf %102, %103 : vector<16x36xf32>
    %cst_28 = arith.constant 5.000000e-01 : f32
    %105 = vector.broadcast %cst_28 : f32 to vector<16x36xf32>
    %106 = arith.mulf %105, %104 : vector<16x36xf32>
    %cst_29 = arith.constant 0.707106769 : f32
    %107 = vector.broadcast %cst_29 : f32 to vector<16x36xf32>
    %108 = arith.mulf %104, %107 : vector<16x36xf32>
    %109 = math.erf %108 : vector<16x36xf32>
    %cst_30 = arith.constant 1.000000e+00 : f32
    %110 = vector.broadcast %cst_30 : f32 to vector<16x36xf32>
    %111 = arith.addf %110, %109 : vector<16x36xf32>
    %112 = arith.mulf %106, %111 : vector<16x36xf32>
    %cst_31 = arith.constant dense<0.000000e+00> : vector<16x9xf32>
    %113 = tpu.matmul %112, %3, %cst_31 {dimension_numbers = #tpu.dot_dimension_numbers<[1], [0], [0], [1], [0, 0, 1, 1], [], []>} : vector<16x36xf32>, vector<36x9xf32>, vector<16x9xf32> -> vector<16x9xf32>
    %114 = vector.broadcast %12 : vector<1x9xf32> to vector<16x9xf32>
    %115 = arith.addf %113, %114 : vector<16x9xf32>
    %116 = arith.addf %79, %115 : vector<16x9xf32>
    %117 = vector.shape_cast %116 : vector<16x9xf32> to vector<2x8x9xf32>
    %c0_32 = arith.constant 0 : index
    %c0_33 = arith.constant 0 : index
    %c0_34 = arith.constant 0 : index
    %118 = vector.load %arg3[%c0_32, %c0_33, %c0_34] : memref<2x8x9xf32, #tpu.memory_space<vmem>>, vector<2x8x9xf32>
    tpu.vector_store %arg3[%c0_32, %c0_33, %c0_34], %117 {strides = array<i32>} : memref<2x8x9xf32, #tpu.memory_space<vmem>>, vector<2x8x9xf32>,
    return
  }
  func.func @transform_0(%arg0: i32) -> (i32, i32, i32) {
    %c0_i32 = arith.constant 0 : i32
    %c0_i32_0 = arith.constant 0 : i32
    %c0_i32_1 = arith.constant 0 : i32
    return %arg0, %c0_i32, %c0_i32_0 : i32, i32, i32
  }
  func.func @transform_1(%arg0: i32) -> (i32, i32) {
    %c0_i32 = arith.constant 0 : i32
    %c0_i32_0 = arith.constant 0 : i32
    %c0_i32_1 = arith.constant 0 : i32
    return %c0_i32, %c0_i32_0 : i32, i32
  }
  func.func @transform_2(%arg0: i32) -> (i32, i32, i32) {
    %c0_i32 = arith.constant 0 : i32
    %c0_i32_0 = arith.constant 0 : i32
    %c0_i32_1 = arith.constant 0 : i32
    return %arg0, %c0_i32, %c0_i32_0 : i32, i32, i32
  }
}

</mosaic_0001>

<bundles_post_ra>
// kernel: tpu_custom_call.1
= control target key start
LH: loop header
LB: loop body
LE: loop exit
PB: predicated region body
PF: predicated region fallthrough
CT: control target
= control target key end

     0   :  { %7 = vsyncpa [#allocation3], 0  ;;  %s2400_s0 = inlined_call_operand.hbm [shape: f32[2,8,9], index: 0, kind: input, shape index: {}]   ;;  %s2401_s1 = inlined_call_operand.hbm [shape: f32[128,128], index: 1, kind: input, shape index: {}]   ;;  %s2402_s2 = inlined_call_operand.hbm [shape: f32[2,8,9], index: 2, kind: output, shape index: {}]  }
   0x1   :  { %8 = vsyncpa [#allocation6], 0 }
   0x2   :  { %9 = vsyncpa [#allocation4], 0  ;;  %s1991_s9 = smov [#allocation2]   ;;  %s1919_s13 = scalar_lea.hbm %s2400_s0, 256 }
   0x3   :  { %s15_s10 = sshll.u32 %s1991_s9, 4  ;;  %p1920_p0 = scmp.ne.s32.totalorder %s2400_s0, %s1919_s13  ;;  %s16_s10 = int_to_ptr.vmem [resolvable:$true] %s15_s10 }
   0x4   :  { %p1923_p1 = scmp.lt.u32.totalorder %s1919_s13, %s2400_s0 }
   0x6   :  { %p1925_p2 = pnand %p1923_p1, %p1920_p0 }
   0x8   :  { %1928 = shalt.err (!%p1925_p2)
}
   0x9   :  { %s1929_s18 = scalar_lea.vmem %s16_s10, 256  ;;  %p1934_p4 = scmp.lt.s32.totalorder %s16_s10, %s16_s10 }
   0xa   :  { %p1930_p3 = scmp.ne.s32.totalorder %s16_s10, %s1929_s18  ;;  %p1935_p5 = scmp.lt.s32.totalorder %s1929_s18, %s1929_s18 }
   0xc   :  { %p1936_p6 = por %p1935_p5, %p1934_p4 }
   0xe   :  { %p1937_p7 = pnand %p1936_p6, %p1930_p3 }
  0x10   :  { %1940 = shalt.err (!%p1937_p7)
}
  0x11   :  { %s1992_s19 = smov 128   ;;  %s1993_s20 = smov 8  }
  0x12   :  { %21 = dma.hbm_to_vmem [thread:$0]  %s2400_s0, 256, %s16_s10, [#allocation3], %s1992_s19, %s1992_s19, %s1993_s20  }
  0x13   :  { %s1994_s23 = smov [#allocation5]   ;;  %s1941_s27 = scalar_lea.hbm %s2401_s1, 2048 }
  0x14   :  { %s27_s24 = sshll.u32 %s1994_s23, 4  ;;  %p1942_p8 = scmp.ne.s32.totalorder %s2401_s1, %s1941_s27  ;;  %s28_s24 = int_to_ptr.vmem [resolvable:$true] %s27_s24 }
  0x15   :  { %p1945_p9 = scmp.lt.u32.totalorder %s1941_s27, %s2401_s1 }
  0x17   :  { %p1947_p10 = pnand %p1945_p9, %p1942_p8 }
  0x19   :  { %1950 = shalt.err (!%p1947_p10)
}
  0x1a   :  { %s1951_s4 = scalar_lea.vmem %s28_s24, 2048  ;;  %p1956_p12 = scmp.lt.s32.totalorder %s28_s24, %s28_s24 }
  0x1b   :  { %p1952_p11 = scmp.ne.s32.totalorder %s28_s24, %s1951_s4  ;;  %p1957_p13 = scmp.lt.s32.totalorder %s1951_s4, %s1951_s4 }
  0x1d   :  { %p1958_p0 = por %p1957_p13, %p1956_p12 }
  0x1f   :  { %p1959_p1 = pnand %p1958_p0, %p1952_p11 }
  0x21   :  { %1962 = shalt.err (!%p1959_p1)
}
  0x22   :  { %33 = dma.hbm_to_vmem [thread:$0]  %s2401_s1, 2048, %s28_s24, [#allocation6], %s1992_s19, %s1992_s19, %s1993_s20  }
  0x23   :  { %1985 = dma.done.wait [#allocation3], 256  }
  0x24   :  { %1986 = vsyncadd [#allocation3], 4294967040 }
  0x25   :  { %1987 = dma.done.wait [#allocation6], 2048  }
  0x26   :  { %1988 = vsyncadd [#allocation6], 4294965248  ;;  %vm57_vm0 = vcmask 72704   ;;  %v55_v0 = vld [vmem:[#allocation2] sm:$0xff]  ;;  %v56_v1 = vld [vmem:[#allocation2 + $0x8] sm:$0xff]  ;;  %vm107_vm1 = vcmask 1040384   ;;  %v85_v20 = vlaneseq }
  0x27   :  { %v58_v2 = vsel %vm57_vm0, %v55_v0, 0.0  ;;  %v61_v3 = vsel %vm57_vm0, %v56_v1, 0.0  ;;  %v40_v14 = vld [vmem:[#allocation5] sm:$0xff]  ;;  %v41_v15 = vld [vmem:[#allocation5 + $0x8] sm:$0x1]  ;;  %vm1995_vm2 = vmmov 1  }
  0x28   :  { %59 = vadd.xlane.f32.xlu0 %v58_v2  ;;  %v1799_v16 = vpack.c.bf16 %v41_v15, %v40_v14  ;;  %vm2049_vm3 = vmpackc.low %vm107_vm1, %vm1995_vm2  ;;  %v2057_v24 = vshrl.u32 %v85_v20, 7  ;;  %v51_v27 = vld [vmem:[#allocation5 + $0x58] sm:$0xff]  ;;  %v52_v39 = vld [vmem:[#allocation5 + $0x60] sm:$0xff]  ;;  %s1996_s1 = smov 119   ;;  %s1997_s6 = smov 110   ;;  %vm953_vm4 = vcmask 1042432  }
  0x29   :  { %v53_v40 = vld [vmem:[#allocation5 + $0x68] sm:$0x1]  ;;  %v1998_v48 = vmov 1966171168   ;;  %vm600_vm5 = vcmask 23552   ;;  %vm1252_vm6 = vcmask 1041409  }
  0x2a   :  { %1801 = vmatprep.subr.msk.bf16.mxu1 %vm2049_vm3, %v1799_v16  ;;  %v2060_v26 = vsub.s32 0, %v2057_v24  ;;  %v93_v28 = vsub.s32 1, %v2057_v24  ;;  %v1805_v41 = vpack.c.bf16 %v53_v40, %v52_v39  ;;  %v99_v42 = vsub.s32 7, %v2057_v24  ;;  %s1999_s7 = smov [#allocation7]  }
  0x2b   :  { %1804 = vmatpush3.bf16.msk.msra.mxu1 %vm2049_vm3, %v1799_v16  ;;  %v190_v49 = vunpack.c.l.s4 %v1998_v48  ;;  %vm1254_vm7 = vcmask 1042434   ;;  %vm1256_vm8 = vcmask 1043459   ;;  %vm1258_vm9 = vcmask 1044484   ;;  %s1598_s8 = sshll.u32 %s1999_s7, 4  ;;  %s1599_s8 = int_to_ptr.vmem [resolvable:$true] %s1598_s8 }
  0x2c   :  { %62 = vadd.xlane.f32.xlu0 %v61_v3  ;;  %v88_v29 = vrot.slane %v51_v27, %v2060_v26  ;;  %v94_v32 = vrot.slane %v51_v27, %v93_v28  ;;  %1807 = vmatprep.subr.msk.bf16.mxu1 %vm2049_vm3, %v1805_v41  ;;  %v100_v43 = vrot.slane %v51_v27, %v99_v42  ;;  %vm1260_vm10 = vcmask 1045509   ;;  %s1963_s9 = scalar_lea.vmem %s1599_s8, 256  ;;  %p1968_p3 = scmp.lt.s32.totalorder %s1599_s8, %s1599_s8 }
  0x2d   :  { %v191_v50 = vunpack.c.0.s8 %v190_v49  ;;  %vm1262_vm11 = vcmask 1046534   ;;  %vm1264_vm12 = vcmask 1047559   ;;  %vm1510_vm13 = vcmask 1043456   ;;  %p1964_p2 = scmp.ne.s32.totalorder %s1599_s8, %s1963_s9  ;;  %p1969_p4 = scmp.lt.s32.totalorder %s1963_s9, %s1963_s9 }
  0x2e   :  { %vm1503_vm14 = vcmask 293888  }
  0x2f   :  { %v194_v51 = vsub.s32 %v191_v50, %v2057_v24  ;;  %p1970_p5 = por %p1969_p4, %p1968_p3 }
  0x31   :  { %p1971_p6 = pnand %p1970_p5, %p1964_p2 }
  0xb5   :  { %v60_v4 = vpop.xlane.xlu0 %59 }
  0xb6   :  { %v65_v5 = vmul.f32 0.11111111, %v60_v4 }
  0xb8   :  { %v67_v6 = vsub.f32 %v55_v0, %v65_v5 }
  0xb9   :  { %v63_v7 = vpop.xlane.xlu0 %62 }
  0xba   :  { %v66_v8 = vmul.f32 0.11111111, %v63_v7  ;;  %v69_v9 = vmul.f32 %v67_v6, %v67_v6 }
  0xbc   :  { %v68_v10 = vsub.f32 %v56_v1, %v66_v8  ;;  %v71_v11 = vsel %vm57_vm0, %v69_v9, 0.0 }
  0xbd   :  { %72 = vadd.xlane.f32.xlu1 %v71_v11 }
  0xbe   :  { %v70_v12 = vmul.f32 %v68_v10, %v68_v10 }
  0xc0   :  { %v74_v13 = vsel %vm57_vm0, %v70_v12, 0.0 }
  0xc1   :  { %75 = vadd.xlane.f32.xlu1 %v74_v13 }
 0x14a   :  { %v73_v18 = vpop.xlane.xlu1 %72 }
 0x14b   :  { %v77_v19 = vmul.f32 0.11111111, %v73_v18 }
 0x14d   :  { %v79_v21 = vadd.f32 1e-05, %v77_v19 }
 0x14e   :  { %v76_v22 = vpop.xlane.xlu1 %75 }
 0x14f   :  { %1840 = vrsqrt.f32 %v79_v21  ;;  %v78_v23 = vmul.f32 0.11111111, %v76_v22 }
 0x151   :  { %v80_v25 = vadd.f32 1e-05, %v78_v23 }
 0x153   :  { %1842 = vrsqrt.f32 %v80_v25 }
 0x159   :  { %v1841_v30 = vpop.eup %1840 }
 0x15a   :  { %v83_v31 = vmul.f32 %v1841_v30, %v67_v6 }
 0x15c   :  { %v89_v33 = vmul.f32 %v88_v29, %v83_v31 }
 0x15d   :  { %v1843_v34 = vpop.eup %1842 }
 0x15e   :  { %v84_v35 = vmul.f32 %v1843_v34, %v68_v10  ;;  %v95_v36 = vadd.f32 %v94_v32, %v89_v33 }
 0x160   :  { %v90_v37 = vmul.f32 %v88_v29, %v84_v35  ;;  %1715 = vmatprep.mubr.msk.f32.mxu1 %vm57_vm0, %v95_v36 }
 0x162   :  { %v96_v38 = vadd.f32 %v94_v32, %v90_v37 }
 0x164   :  { %1716 = vmatmul.mubr.msk.f32.vlgmr.msra.gmra.mrb[0].mxu1 %vm57_vm0, %v96_v38 }
 0x165   :  { %1810 = vmatpush3.bf16.msk.msra.mxu1 %vm2049_vm3, %v1805_v41 }
 0x237   :  { %v1717_v44 = vpop.f32.mrb[0].mxu1 }
 0x238   :  { %v183_v45 = vadd.f32 %v1717_v44, %v100_v43  ;;  %v177_v46 = vpop.f32.mrb[1].mxu1 }
 0x239   :  { %v178_v47 = vadd.f32 %v177_v46, %v100_v43 }
 0x23a   :  { %368 = vrot.lane.b32.xlu1 %v183_v45, %s1996_s1  ;;  %v244_v5 = vrot.slane %v183_v45, %v194_v51  ;;  %v237_v12 = vcombine.high %v183_v45, %v183_v45 }
 0x23b   :  { %366 = vrot.lane.b32.xlu0 %v178_v47, %s1996_s1  ;;  %v195_v52 = vrot.slane %v178_v47, %v194_v51  ;;  %v188_v54 = vcombine.high %v178_v47, %v178_v47 }
 0x23c   :  { %v252_v13 = vcombine.high %v244_v5, %v244_v5  ;;  %v260_v16 = vrot.slane %v244_v5, %v194_v51  ;;  %v251_v21 = vrot.slane %v237_v12, %v194_v51 }
 0x23d   :  { %v203_v53 = vcombine.high %v195_v52, %v195_v52  ;;  %v211_v55 = vrot.slane %v195_v52, %v194_v51  ;;  %v202_v57 = vrot.slane %v188_v54, %v194_v51 }
 0x23e   :  { %1102 = vrot.lane.b32.xlu1 %v178_v47, %s1997_s6  ;;  %v274_v25 = vrot.slane %v252_v13, %v194_v51  ;;  %v321_v27 = vrot.slane %v260_v16, %v2060_v26  ;;  %v282_v28 = vcombine.high %v260_v16, %v260_v16  ;;  %v253_v31 = vcombine.high %v251_v21, %v251_v21 }
 0x23f   :  { %v225_v56 = vrot.slane %v203_v53, %v194_v51  ;;  %v233_v58 = vcombine.high %v211_v55, %v211_v55  ;;  %v289_v59 = vrot.slane %v211_v55, %v2060_v26  ;;  %v204_v61 = vcombine.high %v202_v57, %v202_v57 }
 0x240   :  { %v218_v3 = vrot.slane %v202_v57, %v194_v51  ;;  %v325_v32 = vrot.slane %v274_v25, %v2060_v26  ;;  %v284_v33 = vcombine.high %v274_v25, %v274_v25  ;;  %v329_v34 = vrot.slane %v282_v28, %v2060_v26 }
 0x241   :  { %v293_v60 = vrot.slane %v225_v56, %v2060_v26  ;;  %v235_v63 = vcombine.high %v225_v56, %v225_v56  ;;  %v297_v2 = vrot.slane %v233_v58, %v2060_v26  ;;  %v232_v7 = vrot.slane %v204_v61, %v194_v51 }
 0x242   :  { %1104 = vrot.lane.b32.xlu1 %v183_v45, %s1997_s6  ;;  %v305_v8 = vrot.slane %v218_v3, %v2060_v26  ;;  %v234_v9 = vcombine.high %v218_v3, %v218_v3  ;;  %v267_v35 = vrot.slane %v251_v21, %v194_v51  ;;  %v333_v38 = vrot.slane %v284_v33, %v2060_v26 }
 0x243   :  { %v301_v6 = vrot.slane %v235_v63, %v2060_v26  ;;  %v309_v14 = vrot.slane %v232_v7, %v2060_v26  ;;  %v236_v15 = vcombine.high %v232_v7, %v232_v7  ;;  %v281_v39 = vrot.slane %v253_v31, %v194_v51  ;;  %v54_v51 = vld [vmem:[#allocation5 + $0x70] sm:$0x7] }
 0x244   :  { %v313_v18 = vrot.slane %v234_v9, %v2060_v26  ;;  %v337_v40 = vrot.slane %v267_v35, %v2060_v26  ;;  %v283_v41 = vcombine.high %v267_v35, %v267_v35  ;;  %1746 = vmatprep.subr.msk.mxu0 %vm953_vm4, %v54_v51 }
 0x245   :  { %v317_v23 = vrot.slane %v236_v15, %v2060_v26  ;;  %v341_v44 = vrot.slane %v281_v39, %v2060_v26  ;;  %v285_v45 = vcombine.high %v281_v39, %v281_v39  ;;  %1747 = vmatpush3.msk.msra.mxu0 %vm953_vm4, %v54_v51 }
 0x246   :  { %v345_v46 = vrot.slane %v283_v41, %v2060_v26 }
 0x247   :  { %v349_v49 = vrot.slane %v285_v45, %v2060_v26 }
 0x2ac   :  { %v369_v22 = vpop.permute.xlu1 %368 }
 0x2ad   :  { %v367_v62 = vpop.permute.xlu0 %366  ;;  %v380_v30 = vmul.f32 %v369_v22, %v321_v27  ;;  %v381_v36 = vmul.f32 %v369_v22, %v325_v32  ;;  %v382_v37 = vmul.f32 %v369_v22, %v329_v34  ;;  %v383_v42 = vmul.f32 %v369_v22, %v333_v38 }
 0x2ae   :  { %v372_v0 = vmul.f32 %v367_v62, %v289_v59  ;;  %v373_v1 = vmul.f32 %v367_v62, %v293_v60  ;;  %v374_v4 = vmul.f32 %v367_v62, %v297_v2  ;;  %v375_v10 = vmul.f32 %v367_v62, %v301_v6 }
 0x2af   :  { %v376_v11 = vmul.f32 %v367_v62, %v305_v8  ;;  %v377_v19 = vmul.f32 %v367_v62, %v309_v14  ;;  %v378_v20 = vmul.f32 %v367_v62, %v313_v18  ;;  %v379_v29 = vmul.f32 %v367_v62, %v317_v23 }
 0x2b0   :  { %1722 = vmatprep.mubr.msk.f32.mxu1 %vm57_vm0, %v372_v0  ;;  %v384_v43 = vmul.f32 %v369_v22, %v337_v40  ;;  %v385_v47 = vmul.f32 %v369_v22, %v341_v44  ;;  %v386_v48 = vmul.f32 %v369_v22, %v345_v46  ;;  %v387_v50 = vmul.f32 %v369_v22, %v349_v49 }
 0x2b1   :  { %1723 = vmatmul.mubr.msk.f32.vlgmr.msra.gmra.mrb[2].mxu1 %vm57_vm0, %v373_v1 }
 0x2b2   :  { %1725 = vmatprep.mubr.msk.f32.mxu1 %vm57_vm0, %v374_v4 }
 0x2b5   :  { %1726 = vmatmul.mubr.msk.f32.gmra.mrb[4].mxu1 %vm57_vm0, %v375_v10 }
 0x2b6   :  { %1728 = vmatprep.mubr.msk.f32.mxu1 %vm57_vm0, %v376_v11 }
 0x2b9   :  { %1729 = vmatmul.mubr.msk.f32.gmra.mrb[6].mxu1 %vm57_vm0, %v377_v19 }
 0x2ba   :  { %1731 = vmatprep.mubr.msk.f32.mxu1 %vm57_vm0, %v378_v20 }
 0x2bd   :  { %1732 = vmatmul.mubr.msk.f32.gmra.mrb[8].mxu1 %vm57_vm0, %v379_v29 }
 0x2be   :  { %1734 = vmatprep.mubr.msk.f32.mxu1 %vm57_vm0, %v380_v30 }
 0x2c1   :  { %1735 = vmatmul.mubr.msk.f32.gmra.mrb[10].mxu1 %vm57_vm0, %v381_v36 }
 0x2c2   :  { %1737 = vmatprep.mubr.msk.f32.mxu1 %vm57_vm0, %v382_v37 }
 0x2c5   :  { %1738 = vmatmul.mubr.msk.f32.gmra.mrb[12].mxu1 %vm57_vm0, %v383_v42 }
 0x2c6   :  { %1740 = vmatprep.mubr.msk.f32.mxu1 %vm57_vm0, %v384_v43 }
 0x2c9   :  { %1741 = vmatmul.mubr.msk.f32.gmra.mrb[14].mxu1 %vm57_vm0, %v385_v47 }
 0x2ca   :  { %1743 = vmatprep.mubr.msk.f32.mxu1 %vm57_vm0, %v386_v48 }
 0x2cd   :  { %1744 = vmatmul.mubr.msk.f32.gmra.mrb[16].mxu1 %vm57_vm0, %v387_v50 }
 0x384   :  { %v1724_v52 = vpop.f32.mrb[2].mxu1 }
 0x385   :  { %v585_v53 = vmul.f32 0.57735026, %v1724_v52  ;;  %v505_v54 = vpop.f32.mrb[3].mxu1 }
 0x386   :  { %v584_v55 = vmul.f32 0.57735026, %v505_v54 }
 0x387   :  { %v608_v56 = vsel %vm600_vm5, %v585_v53, -inf }
 0x388   :  { %v609_v57 = vrot.slane %v608_v56, 4  ;;  %v601_v58 = vsel %vm600_vm5, %v584_v55, -inf  ;;  %v1727_v26 = vpop.f32.mrb[4].mxu1 }
 0x389   :  { %v602_v59 = vrot.slane %v601_v58, 4  ;;  %v2106_v60 = vmul.f32 0.57735026, %v1727_v26  ;;  %v515_v61 = vpop.f32.mrb[5].mxu1 }
 0x38a   :  { %v610_v62 = vmax.f32 %v608_v56, %v609_v57  ;;  %v2108_v63 = vmul.f32 0.57735026, %v515_v61 }
 0x38b   :  { %v603_v0 = vmax.f32 %v601_v58, %v602_v59  ;;  %v622_v1 = vsel %vm600_vm5, %v2106_v60, -inf }
 0x38c   :  { %v611_v2 = vrot.slane %v610_v62, 2  ;;  %v623_v3 = vrot.slane %v622_v1, 4  ;;  %v615_v4 = vsel %vm600_vm5, %v2108_v63, -inf  ;;  %v1730_v5 = vpop.f32.mrb[6].mxu1 }
 0x38d   :  { %v604_v6 = vrot.slane %v603_v0, 2  ;;  %v616_v7 = vrot.slane %v615_v4, 4  ;;  %v2114_v8 = vmul.f32 0.57735026, %v1730_v5  ;;  %v525_v9 = vpop.f32.mrb[7].mxu1 }
 0x38e   :  { %v612_v10 = vmax.f32 %v610_v62, %v611_v2  ;;  %v624_v11 = vmax.f32 %v622_v1, %v623_v3  ;;  %v2116_v12 = vmul.f32 0.57735026, %v525_v9 }
 0x38f   :  { %v605_v13 = vmax.f32 %v603_v0, %v604_v6  ;;  %v617_v14 = vmax.f32 %v615_v4, %v616_v7  ;;  %v636_v15 = vsel %vm600_vm5, %v2114_v8, -inf }
 0x390   :  { %v613_v16 = vrot.slane %v612_v10, 1  ;;  %v625_v18 = vrot.slane %v624_v11, 2  ;;  %v637_v19 = vrot.slane %v636_v15, 4  ;;  %v629_v20 = vsel %vm600_vm5, %v2116_v12, -inf  ;;  %v1733_v21 = vpop.f32.mrb[8].mxu1 }
 0x391   :  { %v606_v22 = vrot.slane %v605_v13, 1  ;;  %v618_v23 = vrot.slane %v617_v14, 2  ;;  %v630_v25 = vrot.slane %v629_v20, 4  ;;  %v2122_v27 = vmul.f32 0.57735026, %v1733_v21  ;;  %v535_v28 = vpop.f32.mrb[9].mxu1 }
 0x392   :  { %v614_v29 = vmax.f32 %v612_v10, %v613_v16  ;;  %v626_v30 = vmax.f32 %v624_v11, %v625_v18  ;;  %v638_v31 = vmax.f32 %v636_v15, %v637_v19  ;;  %v2124_v32 = vmul.f32 0.57735026, %v535_v28 }
 0x393   :  { %v607_v33 = vmax.f32 %v605_v13, %v606_v22  ;;  %v619_v34 = vmax.f32 %v617_v14, %v618_v23  ;;  %v631_v35 = vmax.f32 %v629_v20, %v630_v25  ;;  %v650_v36 = vsel %vm600_vm5, %v2122_v27, -inf }
 0x394   :  { %v714_v37 = vsub.f32 %v585_v53, %v614_v29  ;;  %v627_v38 = vrot.slane %v626_v30, 1  ;;  %v639_v39 = vrot.slane %v638_v31, 2  ;;  %v651_v40 = vrot.slane %v650_v36, 4  ;;  %v1736_v41 = vpop.f32.mrb[10].mxu1 }
 0x395   :  { %v713_v42 = vsub.f32 %v584_v55, %v607_v33  ;;  %v620_v43 = vrot.slane %v619_v34, 1  ;;  %v632_v44 = vrot.slane %v631_v35, 2  ;;  %v643_v45 = vsel %vm600_vm5, %v2124_v32, -inf  ;;  %v545_v46 = vpop.f32.mrb[11].mxu1 }
 0x396   :  { %v731_v47 = vmul.f32 1.442695, %v714_v37  ;;  %v628_v48 = vmax.f32 %v626_v30, %v627_v38  ;;  %v640_v49 = vmax.f32 %v638_v31, %v639_v39  ;;  %v652_v50 = vmax.f32 %v650_v36, %v651_v40 }
 0x397   :  { %v729_v51 = vmul.f32 1.442695, %v713_v42  ;;  %v621_v52 = vmax.f32 %v619_v34, %v620_v43  ;;  %v633_v54 = vmax.f32 %v631_v35, %v632_v44  ;;  %v644_v56 = vrot.slane %v643_v45, 4 }
 0x398   :  { %1844 = vpow2.f32 %v731_v47  ;;  %v716_v53 = vsub.f32 %v2106_v60, %v628_v48  ;;  %v641_v57 = vrot.slane %v640_v49, 1  ;;  %v653_v58 = vrot.slane %v652_v50, 2  ;;  %v1739_v55 = vpop.f32.mrb[12].mxu1 }
 0x399   :  { %1846 = vpow2.f32 %v729_v51  ;;  %v715_v26 = vsub.f32 %v2108_v63, %v621_v52  ;;  %v634_v59 = vrot.slane %v633_v54, 1  ;;  %v645_v61 = vmax.f32 %v643_v45, %v644_v56  ;;  %v555_v62 = vpop.f32.mrb[13].mxu1 }
 0x39a   :  { %v735_v0 = vmul.f32 1.442695, %v716_v53  ;;  %v642_v1 = vmax.f32 %v640_v49, %v641_v57  ;;  %v654_v2 = vmax.f32 %v652_v50, %v653_v58  ;;  %v2132_v3 = vmul.f32 0.57735026, %v1736_v41 }
 0x39b   :  { %v733_v4 = vmul.f32 1.442695, %v715_v26  ;;  %v635_v5 = vmax.f32 %v633_v54, %v634_v59  ;;  %v646_v6 = vrot.slane %v645_v61, 2  ;;  %v2134_v7 = vmul.f32 0.57735026, %v545_v46 }
 0x39c   :  { %1848 = vpow2.f32 %v735_v0  ;;  %v718_v60 = vsub.f32 %v2114_v8, %v642_v1  ;;  %v655_v9 = vrot.slane %v654_v2, 1  ;;  %v664_v63 = vsel %vm600_vm5, %v2132_v3, -inf  ;;  %v1742_v10 = vpop.f32.mrb[14].mxu1 }
 0x39d   :  { %1850 = vpow2.f32 %v733_v4  ;;  %v717_v11 = vsub.f32 %v2116_v12, %v635_v5  ;;  %v647_v13 = vmax.f32 %v645_v61, %v646_v6  ;;  %v665_v14 = vrot.slane %v664_v63, 4  ;;  %v2140_v15 = vpop.f32.mrb[15].mxu1 }
 0x39e   :  { %v739_v16 = vmul.f32 1.442695, %v718_v60  ;;  %v656_v18 = vmax.f32 %v654_v2, %v655_v9  ;;  %v657_v19 = vsel %vm600_vm5, %v2134_v7, -inf  ;;  %v2144_v20 = vmul.f32 0.57735026, %v1739_v55 }
 0x39f   :  { %v737_v8 = vmul.f32 1.442695, %v717_v11  ;;  %v648_v21 = vrot.slane %v647_v13, 1  ;;  %v666_v22 = vmax.f32 %v664_v63, %v665_v14  ;;  %v658_v23 = vrot.slane %v657_v19, 4 }
 0x3a0   :  { %1852 = vpow2.f32 %v739_v16  ;;  %v720_v25 = vsub.f32 %v2122_v27, %v656_v18  ;;  %v678_v12 = vsel %vm600_vm5, %v2144_v20, -inf  ;;  %v2149_v28 = vmul.f32 0.57735026, %v555_v62  ;;  %v2151_v29 = vpop.f32.mrb[16].mxu1 }
 0x3a1   :  { %1854 = vpow2.f32 %v737_v8  ;;  %v649_v30 = vmax.f32 %v647_v13, %v648_v21  ;;  %v667_v31 = vrot.slane %v666_v22, 2  ;;  %v659_v33 = vmax.f32 %v657_v19, %v658_v23  ;;  %v2153_v34 = vpop.f32.mrb[17].mxu1 }
 0x3a2   :  { %v2155_v35 = vpop.eup %1844  ;;  %v743_v36 = vmul.f32 1.442695, %v720_v25  ;;  %v679_v37 = vrot.slane %v678_v12, 4  ;;  %v671_v27 = vsel %vm600_vm5, %v2149_v28, -inf  ;;  %v2174_v55 = vmul.f32 0.57735026, %v1742_v10 }
 0x3a3   :  { %v2159_v38 = vpop.eup %1846  ;;  %v768_v39 = vsel %vm600_vm5, %v2155_v35, 0.0  ;;  %v719_v40 = vsub.f32 %v2124_v32, %v649_v30  ;;  %v668_v41 = vmax.f32 %v666_v22, %v667_v31  ;;  %v660_v42 = vrot.slane %v659_v33, 2 }
 0x3a4   :  { %v769_v43 = vrot.slane %v768_v39, 4  ;;  %1856 = vpow2.f32 %v743_v36  ;;  %v680_v44 = vmax.f32 %v678_v12, %v679_v37  ;;  %v761_v50 = vsel %vm600_vm5, %v2159_v38, 0.0 }
 0x3a5   :  { %v741_v45 = vmul.f32 1.442695, %v719_v40  ;;  %v669_v46 = vrot.slane %v668_v41, 1  ;;  %v661_v47 = vmax.f32 %v659_v33, %v660_v42  ;;  %v672_v52 = vrot.slane %v671_v27, 4 }
 0x3a6   :  { %v2164_v48 = vpop.eup %1848  ;;  %v770_v49 = vadd.f32 %v769_v43, %v768_v39  ;;  %v681_v51 = vrot.slane %v680_v44, 2  ;;  %v762_v26 = vrot.slane %v761_v50, 4  ;;  %v692_v14 = vsel %vm600_vm5, %v2174_v55, -inf }
 0x3a7   :  { %v2168_v54 = vpop.eup %1850  ;;  %v782_v32 = vsel %vm600_vm5, %v2164_v48, 0.0  ;;  %1858 = vpow2.f32 %v741_v45  ;;  %v670_v56 = vmax.f32 %v668_v41, %v669_v46  ;;  %v662_v58 = vrot.slane %v661_v47, 1 }
 0x3a8   :  { %v783_v53 = vrot.slane %v782_v32, 4  ;;  %v775_v57 = vsel %vm600_vm5, %v2168_v54, 0.0  ;;  %v682_v62 = vmax.f32 %v680_v44, %v681_v51  ;;  %v771_v1 = vrot.slane %v770_v49, 2 }
 0x3a9   :  { %v776_v59 = vrot.slane %v775_v57, 4  ;;  %v722_v61 = vsub.f32 %v2132_v3, %v670_v56  ;;  %v663_v4 = vmax.f32 %v661_v47, %v662_v58  ;;  %v673_v5 = vmax.f32 %v671_v27, %v672_v52 }
 0x3aa   :  { %v2177_v0 = vpop.eup %1852  ;;  %v784_v2 = vadd.f32 %v783_v53, %v782_v32  ;;  %v683_v10 = vrot.slane %v682_v62, 1  ;;  %v2190_v21 = vadd.f32 %v771_v1, %v770_v49  ;;  %v693_v33 = vrot.slane %v692_v14, 4 }
 0x3ab   :  { %v2179_v6 = vpop.eup %1854  ;;  %v777_v60 = vadd.f32 %v776_v59, %v775_v57  ;;  %v796_v9 = vsel %vm600_vm5, %v2177_v0, 0.0  ;;  %v747_v63 = vmul.f32 1.442695, %v722_v61  ;;  %v721_v19 = vsub.f32 %v2134_v7, %v663_v4 }
 0x3ac   :  { %v785_v11 = vrot.slane %v784_v2, 2  ;;  %v797_v13 = vrot.slane %v796_v9, 4  ;;  %v789_v3 = vsel %vm600_vm5, %v2179_v6, 0.0  ;;  %v684_v23 = vmax.f32 %v682_v62, %v683_v10 }
 0x3ad   :  { %v778_v16 = vrot.slane %v777_v60, 2  ;;  %v790_v18 = vrot.slane %v789_v3, 4  ;;  %1860 = vpow2.f32 %v747_v63  ;;  %v674_v25 = vrot.slane %v673_v5, 2 }
 0x3ae   :  { %v2188_v8 = vpop.eup %1856  ;;  %v798_v22 = vadd.f32 %v797_v13, %v796_v9  ;;  %v745_v31 = vmul.f32 1.442695, %v721_v19  ;;  %v2194_v36 = vadd.f32 %v785_v11, %v784_v2  ;;  %v724_v39 = vsub.f32 %v2144_v20, %v684_v23 }
 0x3af   :  { %v791_v12 = vadd.f32 %v790_v18, %v789_v3  ;;  %v810_v30 = vsel %vm600_vm5, %v2188_v8, 0.0  ;;  %v2199_v40 = vadd.f32 %v778_v16, %v777_v60  ;;  %v675_v41 = vmax.f32 %v673_v5, %v674_v25 }
 0x3b0   :  { %v799_v37 = vrot.slane %v798_v22, 2  ;;  %v811_v27 = vrot.slane %v810_v30, 4  ;;  %1862 = vpow2.f32 %v745_v31  ;;  %v763_v42 = vadd.f32 %v762_v26, %v761_v50 }
 0x3b1   :  { %v2197_v7 = vpop.eup %1858  ;;  %v792_v43 = vrot.slane %v791_v12, 2  ;;  %v751_v45 = vmul.f32 1.442695, %v724_v39  ;;  %v773_v46 = vrot.slane %v2190_v21, 1  ;;  %v676_v49 = vrot.slane %v675_v41, 1 }
 0x3b2   :  { %v803_v44 = vsel %vm600_vm5, %v2197_v7, 0.0  ;;  %v812_v47 = vadd.f32 %v811_v27, %v810_v30  ;;  %v694_v51 = vmax.f32 %v692_v14, %v693_v33  ;;  %v787_v52 = vrot.slane %v2194_v36, 1 }
 0x3b3   :  { %v2205_v20 = vadd.f32 %v799_v37, %v798_v22  ;;  %1864 = vpow2.f32 %v751_v45  ;;  %v2208_v32 = vmul.f32 0.57735026, %v2140_v15  ;;  %v780_v50 = vrot.slane %v2199_v40, 1 }
 0x3b4   :  { %v804_v56 = vrot.slane %v803_v44, 4  ;;  %v677_v53 = vmax.f32 %v675_v41, %v676_v49  ;;  %v695_v57 = vrot.slane %v694_v51, 2  ;;  %v2211_v58 = vadd.f32 %v792_v43, %v791_v12 }
 0x3b5   :  { %v685_v26 = vsel %vm600_vm5, %v2208_v32, -inf  ;;  %v2216_v59 = vmul.f32 0.57735026, %v2151_v29  ;;  %v2219_v61 = vmul.f32 0.57735026, %v2153_v34  ;;  %v813_v15 = vrot.slane %v812_v47, 2 }
 0x3b6   :  { %v723_v1 = vsub.f32 %v2149_v28, %v677_v53  ;;  %v696_v2 = vmax.f32 %v694_v51, %v695_v57  ;;  %v686_v4 = vrot.slane %v685_v26, 4  ;;  %v801_v5 = vrot.slane %v2205_v20, 1 }
 0x3b7   :  { %v2221_v62 = vpop.eup %1860  ;;  %v706_v9 = vsel %vm600_vm5, %v2216_v59, -inf  ;;  %v699_v29 = vsel %vm600_vm5, %v2219_v61, -inf  ;;  %v805_v34 = vadd.f32 %v804_v56, %v803_v44  ;;  %v764_v14 = vrot.slane %v763_v42, 2 }
 0x3b8   :  { %v824_v60 = vsel %vm600_vm5, %v2221_v62, 0.0  ;;  %v749_v10 = vmul.f32 1.442695, %v723_v1  ;;  %v697_v11 = vrot.slane %v696_v2, 1  ;;  %v687_v13 = vmax.f32 %v685_v26, %v686_v4 }
 0x3b9   :  { %v825_v63 = vrot.slane %v824_v60, 4  ;;  %v707_v3 = vrot.slane %v706_v9, 4  ;;  %v700_v28 = vrot.slane %v699_v29, 4  ;;  %v794_v18 = vrot.slane %v2211_v58, 1 }
 0x3ba   :  { %v2231_v16 = vpop.eup %1862  ;;  %v2234_v19 = vadd.f32 %v813_v15, %v812_v47  ;;  %1866 = vpow2.f32 %v749_v10  ;;  %v698_v22 = vmax.f32 %v696_v2, %v697_v11  ;;  %v688_v25 = vrot.slane %v687_v13, 2 }
 0x3bb   :  { %v817_v23 = vsel %vm600_vm5, %v2231_v16, 0.0  ;;  %v708_v12 = vmax.f32 %v706_v9, %v707_v3  ;;  %v701_v30 = vmax.f32 %v699_v29, %v700_v28  ;;  %v806_v31 = vrot.slane %v805_v34, 2 }
 0x3bc   :  { %v818_v33 = vrot.slane %v817_v23, 4  ;;  %v726_v37 = vsub.f32 %v2174_v55, %v698_v22  ;;  %v765_v27 = vadd.f32 %v764_v14, %v763_v42  ;;  %v826_v41 = vadd.f32 %v825_v63, %v824_v60 }
 0x3bd   :  { %v2239_v39 = vpop.eup %1864  ;;  %v689_v43 = vmax.f32 %v687_v13, %v688_v25  ;;  %v709_v44 = vrot.slane %v708_v12, 2  ;;  %v702_v45 = vrot.slane %v701_v30, 2  ;;  %v774_v56 = vadd.f32 %v773_v46, %v2190_v21 }
 0x3be   :  { %v819_v47 = vadd.f32 %v818_v33, %v817_v23  ;;  %v838_v49 = vsel %vm600_vm5, %v2239_v39, 0.0  ;;  %v755_v51 = vmul.f32 1.442695, %v726_v37  ;;  %v807_v1 = vadd.f32 %v806_v31, %v805_v34 }
 0x3bf   :  { %v839_v53 = vrot.slane %v838_v49, 4  ;;  %v690_v57 = vrot.slane %v689_v43, 1  ;;  %v710_v26 = vmax.f32 %v708_v12, %v709_v44  ;;  %v703_v15 = vmax.f32 %v701_v30, %v702_v45 }
 0x3c0   :  { %v820_v55 = vrot.slane %v819_v47, 2  ;;  %1868 = vpow2.f32 %v755_v51  ;;  %v766_v42 = vrot.slane %v765_v27, 1  ;;  %v827_v2 = vrot.slane %v826_v41, 2 }
 0x3c1   :  { %v691_v4 = vmax.f32 %v689_v43, %v690_v57  ;;  %v711_v60 = vrot.slane %v710_v26, 1  ;;  %v704_v9 = vrot.slane %v703_v15, 1  ;;  %v840_v63 = vadd.f32 %v839_v53, %v838_v49 }
 0x3c2   :  { %v821_v29 = vadd.f32 %v820_v55, %v819_v47  ;;  %v767_v10 = vadd.f32 %v766_v42, %v765_v27  ;;  %v781_v11 = vadd.f32 %v780_v50, %v2199_v40  ;;  %1870 = vrcp.f32 %v774_v56 }
 0x3c3   :  { %v725_v13 = vsub.f32 %v2208_v32, %v691_v4  ;;  %v712_v21 = vmax.f32 %v710_v26, %v711_v60  ;;  %v705_v46 = vmax.f32 %v703_v15, %v704_v9  ;;  %v815_v34 = vrot.slane %v2234_v19, 1 }
 0x3c4   :  { %v2246_v3 = vpop.eup %1866  ;;  %v808_v28 = vrot.slane %v807_v1, 1  ;;  %1872 = vrcp.f32 %v767_v10  ;;  %v788_v14 = vadd.f32 %v787_v52, %v2194_v36  ;;  %v828_v22 = vadd.f32 %v827_v2, %v826_v41 }
 0x3c5   :  { %v831_v23 = vsel %vm600_vm5, %v2246_v3, 0.0  ;;  %v753_v40 = vmul.f32 1.442695, %v725_v13  ;;  %v728_v32 = vsub.f32 %v2216_v59, %v712_v21  ;;  %v841_v50 = vrot.slane %v840_v63, 2 }
 0x3c6   :  { %v832_v25 = vrot.slane %v831_v23, 4  ;;  %v727_v12 = vsub.f32 %v2219_v61, %v705_v46  ;;  %1874 = vrcp.f32 %v781_v11  ;;  %v822_v30 = vrot.slane %v821_v29, 1 }
 0x3c7   :  { %1876 = vpow2.f32 %v753_v40  ;;  %v759_v31 = vmul.f32 1.442695, %v728_v32  ;;  %v795_v33 = vadd.f32 %v794_v18, %v2211_v58  ;;  %v802_v36 = vadd.f32 %v801_v5, %v2205_v20 }
 0x3c8   :  { %v833_v37 = vadd.f32 %v832_v25, %v831_v23  ;;  %v757_v27 = vmul.f32 1.442695, %v727_v12  ;;  %1878 = vrcp.f32 %v788_v14  ;;  %v809_v52 = vadd.f32 %v808_v28, %v807_v1 }
 0x3c9   :  { %1880 = vpow2.f32 %v759_v31  ;;  %v829_v41 = vrot.slane %v828_v22, 1  ;;  %v816_v61 = vadd.f32 %v815_v34, %v2234_v19  ;;  %v842_v44 = vadd.f32 %v841_v50, %v840_v63 }
 0x3ca   :  { %v2260_v59 = vpop.eup %1868  ;;  %v834_v43 = vrot.slane %v833_v37, 2  ;;  %1882 = vpow2.f32 %v757_v27  ;;  %v823_v18 = vadd.f32 %v822_v30, %v821_v29 }
 0x3cb   :  { %v852_v58 = vsel %vm600_vm5, %v2260_v59, 0.0  ;;  %1884 = vrcp.f32 %v795_v33  ;;  %v843_v56 = vrot.slane %v842_v44, 1  ;;  %v830_v19 = vadd.f32 %v829_v41, %v828_v22 }
 0x3cc   :  { %v835_v45 = vadd.f32 %v834_v43, %v833_v37  ;;  %v853_v47 = vrot.slane %v852_v58, 4  ;;  %1886 = vrcp.f32 %v802_v36  ;;  %v1871_v49 = vpop.eup %1870 }
 0x3cd   :  { %1888 = vrcp.f32 %v809_v52  ;;  %v890_v15 = vmul.f32 %v1871_v49, %v2155_v35  ;;  %v844_v35 = vadd.f32 %v843_v56, %v842_v44 }
 0x3ce   :  { %v1873_v20 = vpop.eup %1872  ;;  %v836_v5 = vrot.slane %v835_v45, 1  ;;  %v854_v51 = vadd.f32 %v853_v47, %v852_v58  ;;  %1890 = vrcp.f32 %v816_v61 }
 0x3cf   :  { %v889_v53 = vmul.f32 %v1873_v20, %v2159_v38  ;;  %1892 = vrcp.f32 %v823_v18 }
 0x3d0   :  { %v1875_v57 = vpop.eup %1874  ;;  %v855_v26 = vrot.slane %v854_v51, 2  ;;  %v837_v1 = vadd.f32 %v836_v5, %v835_v45 }
 0x3d1   :  { %v2267_v55 = vpop.eup %1876  ;;  %1748 = vmatprep.mubr.msk.f32.mxu0 %vm600_vm5, %v889_v53  ;;  %v891_v42 = vmul.f32 %v1875_v57, %v2168_v54 }
 0x3d2   :  { %v1879_v2 = vpop.eup %1878  ;;  %v856_v4 = vadd.f32 %v855_v26, %v854_v51  ;;  %v845_v60 = vsel %vm600_vm5, %v2267_v55, 0.0  ;;  %1749 = vmatmul.mubr.msk.f32.vlgmr.msra.gmra.mrb[0].mxu0 %vm600_vm5, %v890_v15  ;;  %1894 = vrcp.f32 %v837_v1 }
 0x3d3   :  { %v2274_v38 = vpop.eup %1880  ;;  %v846_v9 = vrot.slane %v845_v60, 4  ;;  %1751 = vmatprep.mubr.msk.f32.mxu0 %vm600_vm5, %v891_v42  ;;  %1896 = vrcp.f32 %v830_v19  ;;  %v892_v54 = vmul.f32 %v1879_v2, %v2164_v48  ;;  %v43_v19 = vld [vmem:[#allocation5 + $0x18] sm:$0x1] }
 0x3d4   :  { %v1883_v29 = vpop.eup %1882  ;;  %v866_v63 = vsel %vm600_vm5, %v2274_v38, 0.0  ;;  %v857_v34 = vrot.slane %v856_v4, 1  ;;  %1898 = vrcp.f32 %v844_v35 }
 0x3d5   :  { %v1885_v10 = vpop.eup %1884  ;;  %v847_v11 = vadd.f32 %v846_v9, %v845_v60  ;;  %v867_v13 = vrot.slane %v866_v63, 4  ;;  %v859_v21 = vsel %vm600_vm5, %v1883_v29, 0.0 }
 0x3d6   :  { %v1887_v46 = vpop.eup %1886  ;;  %v860_v28 = vrot.slane %v859_v21, 4  ;;  %1752 = vmatmul.mubr.msk.f32.gmra.mrb[2].mxu0 %vm600_vm5, %v892_v54  ;;  %v893_v14 = vmul.f32 %v1885_v10, %v2179_v6  ;;  %v858_v37 = vadd.f32 %v857_v34, %v856_v4 }
 0x3d7   :  { %v1889_v22 = vpop.eup %1888  ;;  %v848_v23 = vrot.slane %v847_v11, 2  ;;  %v868_v40 = vadd.f32 %v867_v13, %v866_v63  ;;  %v894_v48 = vmul.f32 %v1887_v46, %v2177_v0 }
 0x3d8   :  { %v1891_v32 = vpop.eup %1890  ;;  %v861_v50 = vadd.f32 %v860_v28, %v859_v21  ;;  %1754 = vmatprep.mubr.msk.f32.mxu0 %vm600_vm5, %v893_v14  ;;  %v895_v25 = vmul.f32 %v1889_v22, %v2197_v7  ;;  %1900 = vrcp.f32 %v858_v37 }
 0x3d9   :  { %v1893_v12 = vpop.eup %1892  ;;  %v849_v30 = vadd.f32 %v848_v23, %v847_v11  ;;  %v869_v31 = vrot.slane %v868_v40, 2  ;;  %v896_v43 = vmul.f32 %v1891_v32, %v2188_v8 }
 0x3da   :  { %v862_v33 = vrot.slane %v861_v50, 2  ;;  %1755 = vmatmul.mubr.msk.f32.gmra.mrb[4].mxu0 %vm600_vm5, %v894_v48  ;;  %v897_v36 = vmul.f32 %v1893_v12, %v2231_v16 }
 0x3db   :  { %v850_v6 = vrot.slane %v849_v30, 1  ;;  %v870_v27 = vadd.f32 %v869_v31, %v868_v40  ;;  %1757 = vmatprep.mubr.msk.f32.mxu0 %vm600_vm5, %v895_v25 }
 0x3dc   :  { %v1895_v52 = vpop.eup %1894  ;;  %v863_v41 = vadd.f32 %v862_v33, %v861_v50 }
 0x3dd   :  { %v1897_v0 = vpop.eup %1896  ;;  %v871_v61 = vrot.slane %v870_v27, 1  ;;  %v851_v7 = vadd.f32 %v850_v6, %v849_v30  ;;  %v899_v58 = vmul.f32 %v1895_v52, %v2246_v3 }
 0x3de   :  { %v864_v44 = vrot.slane %v863_v41, 1  ;;  %1758 = vmatmul.mubr.msk.f32.gmra.mrb[6].mxu0 %vm600_vm5, %v896_v43  ;;  %v898_v45 = vmul.f32 %v1897_v0, %v2221_v62  ;;  %v1899_v47 = vpop.eup %1898 }
 0x3df   :  { %1760 = vmatprep.mubr.msk.f32.mxu0 %vm600_vm5, %v897_v36  ;;  %1902 = vrcp.f32 %v851_v7  ;;  %v872_v18 = vadd.f32 %v871_v61, %v870_v27  ;;  %v900_v8 = vmul.f32 %v1899_v47, %v2239_v39  ;;  %v42_v39 = vld [vmem:[#allocation5 + $0x10] sm:$0xff] }
 0x3e0   :  { %v865_v16 = vadd.f32 %v864_v44, %v863_v41  ;;  %v1811_v57 = vpack.c.bf16 %v43_v19, %v42_v39 }
 0x3e1   :  { %1904 = vrcp.f32 %v872_v18 }
 0x3e2   :  { %1761 = vmatmul.mubr.msk.f32.gmra.mrb[8].mxu0 %vm600_vm5, %v898_v45  ;;  %1906 = vrcp.f32 %v865_v16  ;;  %v1901_v49 = vpop.eup %1900  ;;  %1813 = vmatprep.subr.msk.bf16.mxu0 %vm2049_vm3, %v1811_v57 }
 0x3e3   :  { %1763 = vmatprep.mubr.msk.f32.mxu0 %vm600_vm5, %v899_v58  ;;  %v902_v51 = vmul.f32 %v1901_v49, %v2260_v59  ;;  %1816 = vmatpush3.bf16.msk.msra.mxu0 %vm2049_vm3, %v1811_v57  ;;  %v1103_v59 = vpop.permute.xlu1 %1102 }
 0x3e6   :  { %1764 = vmatmul.mubr.msk.f32.gmra.mrb[10].mxu0 %vm600_vm5, %v900_v8 }
 0x3e9   :  { %v1903_v20 = vpop.eup %1902 }
 0x3ea   :  { %v901_v3 = vmul.f32 %v1903_v20, %v2267_v55 }
 0x3eb   :  { %v1905_v5 = vpop.eup %1904 }
 0x3ec   :  { %v1907_v62 = vpop.eup %1906  ;;  %1766 = vmatprep.mubr.msk.f32.mxu0 %vm600_vm5, %v901_v3  ;;  %v904_v53 = vmul.f32 %v1905_v5, %v2274_v38  ;;  %v2317_v3 = vpop.permute.xlu1 %1104 }
 0x3ed   :  { %1767 = vmatmul.mubr.msk.f32.gmra.mrb[12].mxu0 %vm600_vm5, %v902_v51  ;;  %v903_v56 = vmul.f32 %v1907_v62, %v1883_v29 }
 0x3ef   :  { %1769 = vmatprep.mubr.msk.f32.mxu0 %vm600_vm5, %v903_v56 }
 0x3f1   :  { %1770 = vmatmul.mubr.msk.f32.gmra.mrb[14].mxu0 %vm600_vm5, %v904_v53 }
 0x4a5   :  { %v1750_v26 = vpop.f32.mrb[0].mxu0 }
 0x4a6   :  { %v1109_v15 = vmul.f32 %v1750_v26, %v1103_v59  ;;  %v1023_v1 = vpop.f32.mrb[1].mxu0 }
 0x4a7   :  { %v1108_v55 = vmul.f32 %v1103_v59, %v1023_v1 }
 0x4a8   :  { %v1131_v42 = vsel %vm57_vm0, %v1109_v15, 0.0 }
 0x4a9   :  { %v1132_v2 = vrot.slane %v1131_v42, 4  ;;  %v1124_v4 = vsel %vm57_vm0, %v1108_v55, 0.0  ;;  %v1753_v60 = vpop.f32.mrb[2].mxu0 }
 0x4aa   :  { %v1125_v38 = vrot.slane %v1124_v4, 4  ;;  %v1111_v9 = vmul.f32 %v1753_v60, %v1103_v59  ;;  %v1033_v35 = vpop.f32.mrb[3].mxu0 }
 0x4ab   :  { %v1133_v29 = vadd.f32 %v1132_v2, %v1131_v42  ;;  %v1110_v63 = vmul.f32 %v1103_v59, %v1033_v35 }
 0x4ac   :  { %v1126_v54 = vadd.f32 %v1125_v38, %v1124_v4  ;;  %v1145_v10 = vsel %vm57_vm0, %v1111_v9, 0.0 }
 0x4ad   :  { %v1134_v11 = vrot.slane %v1133_v29, 2  ;;  %v1146_v13 = vrot.slane %v1145_v10, 4  ;;  %v1138_v21 = vsel %vm57_vm0, %v1110_v63, 0.0  ;;  %v1756_v46 = vpop.f32.mrb[4].mxu0 }
 0x4ae   :  { %v1127_v34 = vrot.slane %v1126_v54, 2  ;;  %v1139_v28 = vrot.slane %v1138_v21, 4  ;;  %v1113_v14 = vmul.f32 %v1756_v46, %v1103_v59  ;;  %v1043_v22 = vpop.f32.mrb[5].mxu0 }
 0x4af   :  { %v1135_v23 = vadd.f32 %v1134_v11, %v1133_v29  ;;  %v1147_v40 = vadd.f32 %v1146_v13, %v1145_v10  ;;  %v1112_v32 = vmul.f32 %v1103_v59, %v1043_v22 }
 0x4b0   :  { %v1128_v50 = vadd.f32 %v1127_v34, %v1126_v54  ;;  %v1140_v48 = vadd.f32 %v1139_v28, %v1138_v21  ;;  %v1159_v25 = vsel %vm57_vm0, %v1113_v14, 0.0 }
 0x4b1   :  { %v1136_v12 = vrot.slane %v1135_v23, 1  ;;  %v1148_v30 = vrot.slane %v1147_v40, 2  ;;  %v1160_v31 = vrot.slane %v1159_v25, 4  ;;  %v1152_v33 = vsel %vm57_vm0, %v1112_v32, 0.0  ;;  %v1759_v37 = vpop.f32.mrb[6].mxu0 }
 0x4b2   :  { %v1129_v6 = vrot.slane %v1128_v50, 1  ;;  %v1141_v27 = vrot.slane %v1140_v48, 2  ;;  %v1153_v36 = vrot.slane %v1152_v33, 4  ;;  %v1115_v52 = vmul.f32 %v1759_v37, %v1103_v59  ;;  %v1053_v41 = vpop.f32.mrb[7].mxu0 }
 0x4b3   :  { %v1137_v43 = vadd.f32 %v1136_v12, %v1135_v23  ;;  %v1149_v0 = vadd.f32 %v1148_v30, %v1147_v40  ;;  %v1161_v61 = vadd.f32 %v1160_v31, %v1159_v25  ;;  %v1114_v7 = vmul.f32 %v1103_v59, %v1053_v41 }
 0x4b4   :  { %v1130_v44 = vadd.f32 %v1129_v6, %v1128_v50  ;;  %v1142_v58 = vadd.f32 %v1141_v27, %v1140_v48  ;;  %v1154_v18 = vadd.f32 %v1153_v36, %v1152_v33  ;;  %v1173_v45 = vsel %vm57_vm0, %v1115_v52, 0.0 }
 0x4b5   :  { %v1150_v16 = vrot.slane %v1149_v0, 1  ;;  %v1162_v47 = vrot.slane %v1161_v61, 2  ;;  %v1174_v8 = vrot.slane %v1173_v45, 4  ;;  %v1166_v49 = vsel %vm57_vm0, %v1114_v7, 0.0  ;;  %v1762_v20 = vpop.f32.mrb[8].mxu0 }
 0x4b6   :  { %v1253_v5 = vsel %vm1252_vm6, %v1137_v43, %v1130_v44  ;;  %v1143_v51 = vrot.slane %v1142_v58, 1  ;;  %v1155_v62 = vrot.slane %v1154_v18, 2  ;;  %v1167_v56 = vrot.slane %v1166_v49, 4  ;;  %v1063_v53 = vpop.f32.mrb[9].mxu0 }
 0x4b7   :  { %v1163_v39 = vadd.f32 %v1162_v47, %v1161_v61  ;;  %v1175_v19 = vadd.f32 %v1174_v8, %v1173_v45  ;;  %v1117_v57 = vmul.f32 %v1762_v20, %v2317_v3  ;;  %v1116_v1 = vmul.f32 %v2317_v3, %v1063_v53 }
 0x4b8   :  { %v1144_v59 = vadd.f32 %v1143_v51, %v1142_v58  ;;  %v1156_v26 = vadd.f32 %v1155_v62, %v1154_v18  ;;  %v1168_v15 = vadd.f32 %v1167_v56, %v1166_v49  ;;  %v1151_v55 = vadd.f32 %v1150_v16, %v1149_v0 }
 0x4b9   :  { %v1176_v42 = vrot.slane %v1175_v19, 2  ;;  %v1187_v2 = vsel %vm57_vm0, %v1117_v57, 0.0  ;;  %v1765_v4 = vpop.f32.mrb[10].mxu0  ;;  %v1164_v63 = vrot.slane %v1163_v39, 1  ;;  %v1180_v10 = vsel %vm57_vm0, %v1116_v1, 0.0 }
 0x4ba   :  { %v1255_v60 = vsel %vm1254_vm7, %v1144_v59, %v1253_v5  ;;  %v1157_v38 = vrot.slane %v1156_v26, 1  ;;  %v1169_v9 = vrot.slane %v1168_v15, 2  ;;  %v1188_v35 = vrot.slane %v1187_v2, 4  ;;  %v1073_v29 = vpop.f32.mrb[11].mxu0 }
 0x4bb   :  { %v1177_v54 = vadd.f32 %v1176_v42, %v1175_v19  ;;  %v1119_v11 = vmul.f32 %v1765_v4, %v2317_v3  ;;  %v1181_v34 = vrot.slane %v1180_v10, 4  ;;  %v1118_v14 = vmul.f32 %v2317_v3, %v1073_v29 }
 0x4bc   :  { %v1158_v13 = vadd.f32 %v1157_v38, %v1156_v26  ;;  %v1170_v21 = vadd.f32 %v1169_v9, %v1168_v15  ;;  %v1189_v46 = vadd.f32 %v1188_v35, %v1187_v2  ;;  %v1257_v22 = vsel %vm1256_vm8, %v1151_v55, %v1255_v60 }
 0x4bd   :  { %v1201_v28 = vsel %vm57_vm0, %v1119_v11, 0.0  ;;  %v1182_v32 = vadd.f32 %v1181_v34, %v1180_v10  ;;  %v1165_v48 = vadd.f32 %v1164_v63, %v1163_v39  ;;  %v1178_v25 = vrot.slane %v1177_v54, 1 }
 0x4be   :  { %v1171_v23 = vrot.slane %v1170_v21, 1  ;;  %v1190_v40 = vrot.slane %v1189_v46, 2  ;;  %v1202_v50 = vrot.slane %v1201_v28, 4  ;;  %v1194_v12 = vsel %vm57_vm0, %v1118_v14, 0.0 }
 0x4bf   :  { %v1259_v30 = vsel %vm1258_vm9, %v1158_v13, %v1257_v22  ;;  %v1183_v37 = vrot.slane %v1182_v32, 2  ;;  %v1195_v36 = vrot.slane %v1194_v12, 4  ;;  %v1179_v58 = vadd.f32 %v1178_v25, %v1177_v54 }
 0x4c0   :  { %v1172_v31 = vadd.f32 %v1171_v23, %v1170_v21  ;;  %v1191_v33 = vadd.f32 %v1190_v40, %v1189_v46  ;;  %v1203_v6 = vadd.f32 %v1202_v50, %v1201_v28  ;;  %v1768_v27 = vpop.f32.mrb[12].mxu0  ;;  %v1261_v43 = vsel %vm1260_vm10, %v1165_v48, %v1259_v30 }
 0x4c1   :  { %v1121_v52 = vmul.f32 %v1768_v27, %v2317_v3  ;;  %v1083_v41 = vpop.f32.mrb[13].mxu0  ;;  %v1184_v61 = vadd.f32 %v1183_v37, %v1182_v32  ;;  %v1196_v18 = vadd.f32 %v1195_v36, %v1194_v12  ;;  %v1359_v27 = vsub.s32 4, %v2057_v24  ;;  %v2352_v36 = vld [vmem:[#allocation5 + $0x58] sm:$0xff] }
 0x4c2   :  { %v1192_v0 = vrot.slane %v1191_v33, 1  ;;  %v1204_v7 = vrot.slane %v1203_v6, 2  ;;  %v1120_v44 = vmul.f32 %v2317_v3, %v1083_v41  ;;  %v1263_v16 = vsel %vm1262_vm11, %v1172_v31, %v1261_v43  ;;  %v1917_v43 = vld [vmem:[#allocation2 + $0x8] sm:$0xff] }
 0x4c3   :  { %v1215_v45 = vsel %vm57_vm0, %v1121_v52, 0.0  ;;  %v1185_v8 = vrot.slane %v1184_v61, 1  ;;  %v1197_v51 = vrot.slane %v1196_v18, 2  ;;  %v1265_v39 = vsel %vm1264_vm12, %v1179_v58, %v1263_v16 }
 0x4c4   :  { %v1193_v47 = vadd.f32 %v1192_v0, %v1191_v33  ;;  %v1205_v49 = vadd.f32 %v1204_v7, %v1203_v6  ;;  %v1216_v20 = vrot.slane %v1215_v45, 4  ;;  %v1771_v5 = vpop.f32.mrb[14].mxu0  ;;  %v1208_v62 = vsel %vm57_vm0, %v1120_v44, 0.0  ;;  %1776 = vmatprep.mubr.msk.f32.mxu0 %vm57_vm0, %v1265_v39  ;;  %v1918_v7 = vld [vmem:[#allocation2] sm:$0xff] }
 0x4c5   :  { %v1123_v56 = vmul.f32 %v1771_v5, %v2317_v3  ;;  %v1093_v53 = vpop.f32.mrb[15].mxu0  ;;  %v1186_v19 = vadd.f32 %v1185_v8, %v1184_v61  ;;  %v1209_v59 = vrot.slane %v1208_v62, 4  ;;  %v1198_v26 = vadd.f32 %v1197_v51, %v1196_v18 }
 0x4c6   :  { %v1217_v57 = vadd.f32 %v1216_v20, %v1215_v45  ;;  %v1122_v1 = vmul.f32 %v2317_v3, %v1093_v53  ;;  %v1206_v42 = vrot.slane %v1205_v49, 1  ;;  %v1360_v52 = vrot.slane %v2352_v36, %v1359_v27 }
 0x4c7   :  { %v1229_v15 = vsel %vm57_vm0, %v1123_v56, 0.0  ;;  %v1266_v55 = vsel %vm1252_vm6, %v1193_v47, %v1186_v19  ;;  %v1210_v4 = vadd.f32 %v1209_v59, %v1208_v62  ;;  %v1199_v60 = vrot.slane %v1198_v26, 1  ;;  %v44_v19 = vld [vmem:[#allocation5 + $0x20] sm:$0xff] }
 0x4c8   :  { %v1218_v2 = vrot.slane %v1217_v57, 2  ;;  %v1230_v38 = vrot.slane %v1229_v15, 4  ;;  %v1222_v9 = vsel %vm57_vm0, %v1122_v1, 0.0  ;;  %v1207_v11 = vadd.f32 %v1206_v42, %v1205_v49 }
 0x4c9   :  { %v1211_v29 = vrot.slane %v1210_v4, 2  ;;  %v1223_v63 = vrot.slane %v1222_v9, 4  ;;  %v1200_v54 = vadd.f32 %v1199_v60, %v1198_v26  ;;  %v46_v26 = vld [vmem:[#allocation5 + $0x30] sm:$0xff] }
 0x4ca   :  { %v1219_v35 = vadd.f32 %v1218_v2, %v1217_v57  ;;  %v1231_v10 = vadd.f32 %v1230_v38, %v1229_v15  ;;  %v45_v57 = vld [vmem:[#allocation5 + $0x28] sm:$0x1]  ;;  %v47_v15 = vld [vmem:[#allocation5 + $0x38] sm:$0xff] }
 0x4cb   :  { %v1212_v13 = vadd.f32 %v1211_v29, %v1210_v4  ;;  %v1224_v21 = vadd.f32 %v1223_v63, %v1222_v9  ;;  %v1267_v46 = vsel %vm1254_vm7, %v1200_v54, %v1266_v55  ;;  %v1817_v59 = vpack.c.bf16 %v45_v57, %v44_v19 }
 0x4cc   :  { %v1220_v3 = vrot.slane %v1219_v35, 1  ;;  %v1232_v34 = vrot.slane %v1231_v10, 2  ;;  %v1268_v14 = vsel %vm1256_vm8, %v1207_v11, %v1267_v46  ;;  %v1823_v1 = vpack.c.bf16 %v47_v15, %v46_v26 }
 0x4cd   :  { %v1213_v28 = vrot.slane %v1212_v13, 1  ;;  %v1225_v22 = vrot.slane %v1224_v21, 2  ;;  %1819 = vmatprep.subr.msk.bf16.mxu0 %vm2049_vm3, %v1817_v59  ;;  %v1391_v9 = vsub.s32 2, %v2057_v24 }
 0x4ce   :  { %v1233_v23 = vadd.f32 %v1232_v34, %v1231_v10  ;;  %v1221_v50 = vadd.f32 %v1220_v3, %v1219_v35  ;;  %1824 = vmatprep.subr.bf16.mxu1 %v1823_v1  ;;  %v1397_v35 = vsub.s32 3, %v2057_v24  ;;  %v48_v34 = vld [vmem:[#allocation5 + $0x40] sm:$0xff] }
 0x4cf   :  { %v1214_v40 = vadd.f32 %v1213_v28, %v1212_v13  ;;  %v1226_v32 = vadd.f32 %v1225_v22, %v1224_v21  ;;  %1826 = vmatpush3.bf16.msra.mxu1 %v1823_v1  ;;  %v1392_v17 = vrot.slane %v2352_v36, %v1391_v9  ;;  %v49_v28 = vld [vmem:[#allocation5 + $0x48] sm:$0xff]  ;;  %v50_v22 = vld [vmem:[#allocation5 + $0x50] sm:$0xf] }
 0x4d0   :  { %v1234_v48 = vrot.slane %v1233_v23, 1  ;;  %v1398_v54 = vrot.slane %v2352_v36, %v1397_v35 }
 0x4d1   :  { %v1269_v25 = vsel %vm1258_vm9, %v1214_v40, %v1268_v14  ;;  %v1227_v12 = vrot.slane %v1226_v32, 1  ;;  %v1827_v14 = vpack.c.bf16 %v49_v28, %v48_v34 }
 0x4d2   :  { %v1270_v30 = vsel %vm1260_vm10, %v1221_v50, %v1269_v25  ;;  %v1235_v33 = vadd.f32 %v1234_v48, %v1233_v23  ;;  %v1403_v23 = vsub.s32 6, %v2057_v24 }
 0x4d3   :  { %v1228_v31 = vadd.f32 %v1227_v12, %v1226_v32  ;;  %1828 = vmatprep.subr.bf16.mxu1 %v1827_v14 }
 0x4d4   :  { %1830 = vmatpush3.bf16.msra.mxu1 %v1827_v14  ;;  %v1404_v40 = vrot.slane %v2352_v36, %v1403_v23 }
 0x4d5   :  { %v1271_v37 = vsel %vm1262_vm11, %v1228_v31, %v1270_v30  ;;  %1794 = vmatprep.subr.msk.mxu1 %vm1510_vm13, %v50_v22 }
 0x4d6   :  { %v1272_v6 = vsel %vm1264_vm12, %v1235_v33, %v1271_v37 }
 0x4d7   :  { %1777 = vmatmul.mubr.msk.f32.vlgmr.msra.gmra.mrb[16].mxu0 %vm57_vm0, %v1272_v6 }
 0x4d8   :  { %1822 = vmatpush3.bf16.msk.msra.mxu0 %vm2049_vm3, %v1817_v59  ;;  %1795 = vmatpush3.msk.msra.mxu1 %vm1510_vm13, %v50_v22 }
 0x5aa   :  { %v1778_v41 = vpop.f32.mrb[16].mxu0 }
 0x5ab   :  { %v1356_v0 = vadd.f32 %v1917_v43, %v1778_v41  ;;  %v1346_v61 = vpop.f32.mrb[17].mxu0 }
 0x5ac   :  { %v1355_v44 = vadd.f32 %v1918_v7, %v1346_v61 }
 0x5ad   :  { %v2355_v58 = vadd.f32 %v1360_v52, %v1356_v0  ;;  %v1501_v0 = vsub.s32 5, %v2057_v24 }
 0x5ae   :  { %v2357_v18 = vadd.f32 %v1360_v52, %v1355_v44 }
 0x5af   :  { %v1366_v45 = vsel %vm57_vm0, %v2355_v58, 0.0  ;;  %v1502_v61 = vrot.slane %v2352_v36, %v1501_v0 }
 0x5b0   :  { %1367 = vadd.xlane.f32.xlu1 %v1366_v45  ;;  %v1363_v16 = vsel %vm57_vm0, %v2357_v18, 0.0 }
 0x5b1   :  { %1364 = vadd.xlane.f32.xlu0 %v1363_v16 }
 0x63d   :  { %v1368_v47 = vpop.xlane.xlu1 %1367 }
 0x63e   :  { %v1370_v8 = vmul.f32 0.11111111, %v1368_v47  ;;  %v1365_v49 = vpop.xlane.xlu0 %1364 }
 0x63f   :  { %v1369_v20 = vmul.f32 0.11111111, %v1365_v49 }
 0x640   :  { %v1372_v5 = vsub.f32 %v2355_v58, %v1370_v8 }
 0x641   :  { %v1371_v51 = vsub.f32 %v2357_v18, %v1369_v20 }
 0x642   :  { %v1374_v53 = vmul.f32 %v1372_v5, %v1372_v5 }
 0x643   :  { %v1373_v62 = vmul.f32 %v1371_v51, %v1371_v51 }
 0x644   :  { %v1378_v39 = vsel %vm57_vm0, %v1374_v53, 0.0 }
 0x645   :  { %v1375_v56 = vsel %vm57_vm0, %v1373_v62, 0.0 }
 0x646   :  { %1376 = vadd.xlane.f32.xlu0 %v1375_v56 }
 0x64a   :  { %1379 = vadd.xlane.f32.xlu0 %v1378_v39 }
 0x6d3   :  { %v1377_v55 = vpop.xlane.xlu0 %1376 }
 0x6d4   :  { %v1381_v42 = vmul.f32 0.11111111, %v1377_v55 }
 0x6d6   :  { %v1383_v2 = vadd.f32 1e-05, %v1381_v42 }
 0x6d7   :  { %v1380_v4 = vpop.xlane.xlu0 %1379 }
 0x6d8   :  { %1908 = vrsqrt.f32 %v1383_v2  ;;  %v1382_v60 = vmul.f32 0.11111111, %v1380_v4 }
 0x6da   :  { %v1384_v38 = vadd.f32 1e-05, %v1382_v60 }
 0x6dc   :  { %1910 = vrsqrt.f32 %v1384_v38 }
 0x6e2   :  { %v1909_v29 = vpop.eup %1908 }
 0x6e3   :  { %v1387_v63 = vmul.f32 %v1909_v29, %v1371_v51 }
 0x6e5   :  { %v1393_v10 = vmul.f32 %v1392_v17, %v1387_v63 }
 0x6e6   :  { %v1911_v11 = vpop.eup %1910 }
 0x6e7   :  { %v1388_v13 = vmul.f32 %v1911_v11, %v1372_v5  ;;  %v1399_v21 = vadd.f32 %v1398_v54, %v1393_v10 }
 0x6e9   :  { %v1394_v46 = vmul.f32 %v1392_v17, %v1388_v13  ;;  %1783 = vmatprep.mubr.msk.f32.mxu0 %vm57_vm0, %v1399_v21 }
 0x6eb   :  { %v1400_v3 = vadd.f32 %v1398_v54, %v1394_v46 }
 0x6ed   :  { %1784 = vmatmul.mubr.msk.f32.vlgmr.msra.gmra.mrb[18].mxu0 %vm57_vm0, %v1400_v3 }
 0x7c0   :  { %v1785_v32 = vpop.f32.mrb[18].mxu0 }
 0x7c1   :  { %v1486_v50 = vadd.f32 %v1785_v32, %v1404_v40  ;;  %v1480_v48 = vpop.f32.mrb[19].mxu0 }
 0x7c2   :  { %v1481_v25 = vadd.f32 %v1480_v48, %v1404_v40 }
 0x7c3   :  { %v1492_v12 = vmul.f32 0.70710677, %v1486_v50  ;;  %v1490_v52 = vmul.f32 0.5, %v1486_v50 }
 0x7c4   :  { %v1491_v30 = vmul.f32 0.70710677, %v1481_v25  ;;  %v1489_v6 = vmul.f32 0.5, %v1481_v25 }
 0x7c5   :  { %1912 = verf.f32 %v1492_v12 }
 0x7c6   :  { %1914 = verf.f32 %v1491_v30 }
 0x7cf   :  { %v1913_v31 = vpop.eup %1912 }
 0x7d0   :  { %v1915_v33 = vpop.eup %1914  ;;  %v1496_v37 = vadd.f32 1.0, %v1913_v31 }
 0x7d1   :  { %v1495_v27 = vadd.f32 1.0, %v1915_v33 }
 0x7d2   :  { %v1498_v43 = vmul.f32 %v1496_v37, %v1490_v52 }
 0x7d3   :  { %v1497_v41 = vmul.f32 %v1495_v27, %v1489_v6 }
 0x7d5   :  { %1796 = vmatprep.mubr.msk.f32.mxu1 %vm1503_vm14, %v1497_v41 }
 0x7d6   :  { %1797 = vmatmul.mubr.msk.f32.vlgmr.msra.gmra.mrb[18].mxu1 %vm1503_vm14, %v1498_v43 }
 0x8a9   :  { %v1798_v7 = vpop.f32.mrb[18].mxu1 }
 0x8aa   :  { %v1586_v44 = vadd.f32 %v1798_v7, %v1502_v61  ;;  %v1580_v45 = vpop.f32.mrb[19].mxu1 }
 0x8ab   :  { %v1581_v16 = vadd.f32 %v1580_v45, %v1502_v61 }
 0x8ac   :  { %v1590_v47 = vadd.f32 %v1586_v44, %v2355_v58 }
 0x8ad   :  { %v1589_v8 = vadd.f32 %v1581_v16, %v2357_v18 }
 0x8ae   :  { %1592 = vst.msk [vmem:[#allocation7 + $0x8] sm:$0xff] %vm57_vm0, %v1590_v47 }
 0x8af   :  { %1591 = vst.msk [vmem:[#allocation7] sm:$0xff] %vm57_vm0, %v1589_v8 }
 0x8b0   :  { %1974 = shalt.err (!%p1971_p6)
}
 0x8b1   :  { %s1975_s12 = scalar_lea.hbm %s2402_s2, 256 }
 0x8b2   :  { %p1976_p7 = scmp.ne.s32.totalorder %s2402_s2, %s1975_s12  ;;  %p1979_p8 = scmp.lt.u32.totalorder %s1975_s12, %s2402_s2 }
 0x8b4   :  { %p1981_p9 = pnand %p1979_p8, %p1976_p7 }
 0x8b6   :  { %1984 = shalt.err (!%p1981_p9)
}
 0x8b7   :  { %1604 = dma.vmem_to_hbm [thread:$0]  %s1599_s8, 256, %s2402_s2, [#allocation4], %s1992_s19, %s1992_s19, %s1993_s20  }
 0x8b8   :  { %1989 = dma.done.wait [#allocation4], 256  }
 0x8b9   :  { %1990 = vsyncadd [#allocation4], 4294967040 }
 0x8ba   :  { %1608 = vsyncpa [#allocation3], 1 }
 0x8bb   :  { %1609 = vsyncpa [#allocation6], 1 }
 0x8bc   :  { %1610 = vsyncpa [#allocation4], 1 }

</bundles_post_ra>
